<compile_context>
chip_gen: v7x
topology: tpu7x:2x2x1
jax: 0.10.0
libtpu: 0.0.40
codegen_flags: <defaults>
</compile_context>

<pallas_src>
import functools

import jax
import jax.numpy as jnp
import numpy as np
from jax.experimental import pallas as pl
from jax.experimental.pallas import tpu as pltpu

MXU_DTYPE = jnp.bfloat16
NEG_BIG = -1e11            # PyTorch uses -1e11 for masked scores (plain float!)
PAD_BIAS = -1e30           # padded-vocab bias -> exp() underflows to 0


def _round_up(x, m):
    return ((x + m - 1) // m) * m


# -----------------------------------------------------------------------------
# Parameter preparation (done ONCE, hoisted out of the per-step wrapper)
# -----------------------------------------------------------------------------
def prepare_params(raw, mxu_dtype=MXU_DTYPE, tv=None):
    """Pre-transpose / pre-split / pre-pad / pre-cast all weights."""
    H = raw['w_hh'].shape[1]
    A = raw['w_out'].shape[0]
    V = raw['w_out2'].shape[0]
    if tv is None:
        # Lane-dense vocab tile: multiple of 128, capped at 512 (fits v7x's 64MiB
        # VMEM comfortably even for large A with double buffering).
        tv = min(512, _round_up(V, 128))
    v_pad = _round_up(V, tv)

    # LSTM: split (4H, H) weights per gate -> (4, H, H) stacked, pre-transposed
    # to (in, out); fuse the two biases into one (4, 1, H).
    wih4 = jnp.stack([raw['w_ih'][k * H:(k + 1) * H, :].T for k in range(4)])
    whh4 = jnp.stack([raw['w_hh'][k * H:(k + 1) * H, :].T for k in range(4)])
    bg = (raw['b_ih'] + raw['b_hh']).reshape(4, 1, H).astype(jnp.float32)

    # Attention-vector layer: cat(ctx, h) @ W^T  ==  ctx@W1 + h@W2
    w1 = raw['w_out'][:, :H].T.astype(mxu_dtype)          # (H, A)
    w2 = raw['w_out'][:, H:].T.astype(mxu_dtype)          # (H, A)
    b_out = raw['b_out'].reshape(1, A).astype(jnp.float32)

    # Vocab projection, padded to v_pad; padded columns get a huge negative bias
    # so they contribute nothing to the logsumexp.
    w_v = jnp.zeros((A, v_pad), mxu_dtype).at[:, :V].set(
        raw['w_out2'].T.astype(mxu_dtype))
    b_v = jnp.full((1, v_pad), PAD_BIAS, jnp.float32).at[:, :V].set(
        raw['b_out2'].astype(jnp.float32))

    return dict(embedding=raw['embedding'].astype(jnp.float32),
                wih4=wih4.astype(mxu_dtype), whh4=whh4.astype(mxu_dtype), bg=bg,
                w1=w1, w2=w2, b_out=b_out, w_v=w_v, b_v=b_v,
                H=H, A=A, V=V, v_pad=v_pad, tv=tv, mxu_dtype=mxu_dtype)


# -----------------------------------------------------------------------------
# Pallas kernel + wrapper
# -----------------------------------------------------------------------------
def _make_kernel(NT, NV, TT, B_pad):
    f32 = jnp.float32

    def kernel(x_ref, ph_ref, pc_ref, len_ref, enc_ref,
               wih_ref, whh_ref, bg_ref, w1_ref, w2_ref, bo_ref,
               wv_ref, bv_ref,
               logits_ref, lse_ref, h_out_ref, c_out_ref,
               m_att, l_att, ctx_acc, att_scr, h_scr, m_v, l_v):
        i = pl.program_id(0)

        # -------- step 0: LSTM cell + init running-softmax state -------------
        @pl.when(i == 0)
        def _():
            x = x_ref[...]                                  # (B, H)  bf16
            hp = ph_ref[...]                                # (B, H)  f32
            cp = pc_ref[...]
            hb = hp.astype(x.dtype)

            def gate(k):                                    # lane-aligned per-gate matmuls
                return (jnp.dot(x, wih_ref[k], preferred_element_type=f32)
                        + jnp.dot(hb, whh_ref[k], preferred_element_type=f32)
                        + bg_ref[k])

            i_g = jax.nn.sigmoid(gate(0))
            f_g = jax.nn.sigmoid(gate(1))
            g_g = jnp.tanh(gate(2))
            o_g = jax.nn.sigmoid(gate(3))
            c = f_g * cp + i_g * g_g
            h = o_g * jnp.tanh(c)
            h_scr[...] = h
            h_out_ref[...] = h
            c_out_ref[...] = c

            m_att[...] = jnp.full_like(m_att, -jnp.inf)
            l_att[...] = jnp.zeros_like(l_att)
            ctx_acc[...] = jnp.zeros_like(ctx_acc)
            m_v[...] = jnp.full_like(m_v, -jnp.inf)
            l_v[...] = jnp.zeros_like(l_v)

        # -------- attention phase: online softmax over encoder-T tiles -------
        @pl.when(i < NT)
        def _():
            h = h_scr[...]                                  # (B, H) f32
            enc = enc_ref[...].astype(f32)                  # (B, TT, H)
            # scores[b, t] = sum_h enc[b, t, h] * h[b, h]  (VPU mul + reduce;
            # tiny vs the 2-D MXU matmuls, and avoids batched mat-vec lowering)
            s = jnp.sum(enc * h[:, None, :], axis=2)        # (B, TT) f32
            pos = i * TT + jax.lax.broadcasted_iota(jnp.int32, (B_pad, TT), 1)
            valid = pos < len_ref[...]                      # length-based mask
            s = jnp.where(valid, s, NEG_BIG)

            m_prev = m_att[...]
            m_new = jnp.maximum(m_prev, jnp.max(s, axis=1, keepdims=True))
            alpha = jnp.exp(m_prev - m_new)
            p = jnp.exp(s - m_new)                          # (B, TT) f32
            l_att[...] = alpha * l_att[...] + jnp.sum(p, axis=1, keepdims=True)
            # context accumulation: ctx[b, h] += sum_t p[b, t] * enc[b, t, h]
            pv = jnp.sum(p[:, :, None] * enc, axis=1)       # (B, H) f32
            ctx_acc[...] = alpha * ctx_acc[...] + pv
            m_att[...] = m_new

        # -------- end of attention: build attention vector --------------------
        @pl.when(i == NT - 1)
        def _():
            ctx = ctx_acc[...] / l_att[...]                 # (B, H) f32
            h = h_scr[...]
            att = jnp.tanh(
                jnp.dot(ctx.astype(w1_ref.dtype), w1_ref[...],
                        preferred_element_type=f32)
                + jnp.dot(h.astype(w2_ref.dtype), w2_ref[...],
                          preferred_element_type=f32)
                + bo_ref[...])                              # (B, A) f32
            att_scr[...] = att

        # -------- vocab phase: logits tile + online logsumexp -----------------
        @pl.when(i >= NT)
        def _():
            att = att_scr[...].astype(wv_ref.dtype)
            logits = (jnp.dot(att, wv_ref[...], preferred_element_type=f32)
                      + bv_ref[...])                        # (B, TV) f32, lane-dense
            logits_ref[...] = logits
            m_prev = m_v[...]
            m_new = jnp.maximum(m_prev, jnp.max(logits, axis=1, keepdims=True))
            l_v[...] = (jnp.exp(m_prev - m_new) * l_v[...]
                        + jnp.sum(jnp.exp(logits - m_new), axis=1, keepdims=True))
            m_v[...] = m_new

        @pl.when(i == NT + NV - 1)
        def _():
            lse_ref[...] = m_v[...] + jnp.log(l_v[...])

    return kernel


def dot_atten_decoder_forward(prep, input_ids, prev_h, prev_c,
                              encoder_output, lengths):
    """One decoder step. Returns (log_probs (B, V), h (B, H), c (B, H)).

    encoder_output is the padded (B, T, H) tensor (padding rows zero) plus the
    per-sequence lengths — i.e. the information carried by the PackedSequence
    in the PyTorch module.
    """
    f32 = jnp.float32
    mxu = prep['mxu_dtype']
    B, H = prev_h.shape
    T = encoder_output.shape[1]
    A, V, v_pad, TV = prep['A'], prep['V'], prep['v_pad'], prep['tv']

    B_pad = _round_up(max(B, 8), 8)          # sublane height
    TT = min(128, _round_up(T, 8))           # encoder-T tile
    T_pad = _round_up(T, TT)
    NT = T_pad // TT
    NV = v_pad // TV
    n_steps = NT + NV

    # glue: embedding lookup + dropout(p=0) == identity
    x = prep['embedding'][input_ids]                         # (B, H) f32

    # pad batch / T; cast MXU operands to bf16 once, outside the kernel
    x_p = jnp.zeros((B_pad, H), mxu).at[:B].set(x.astype(mxu))
    h_p = jnp.zeros((B_pad, H), f32).at[:B].set(prev_h.astype(f32))
    c_p = jnp.zeros((B_pad, H), f32).at[:B].set(prev_c.astype(f32))
    enc_p = jnp.zeros((B_pad, T_pad, H), mxu).at[:B, :T].set(
        encoder_output.astype(mxu))
    len_p = jnp.zeros((B_pad, 1), jnp.int32).at[:B, 0].set(
        jnp.asarray(lengths, jnp.int32))

    const2 = lambda i: (0, 0)
    const3 = lambda i: (0, 0, 0)
    enc_map = lambda i: (0, jnp.minimum(i, NT - 1), 0)
    voc_map = lambda i: (0, jnp.maximum(i - NT, 0))

    in_specs = [
        pl.BlockSpec((B_pad, H), const2),            # x (embedded token)
        pl.BlockSpec((B_pad, H), const2),            # prev_h
        pl.BlockSpec((B_pad, H), const2),            # prev_c
        pl.BlockSpec((B_pad, 1), const2),            # lengths
        pl.BlockSpec((B_pad, TT, H), enc_map),       # encoder output (streamed)
        pl.BlockSpec((4, H, H), const3),             # W_ih (per-gate)
        pl.BlockSpec((4, H, H), const3),             # W_hh (per-gate)
        pl.BlockSpec((4, 1, H), const3),             # fused gate bias
        pl.BlockSpec((H, A), const2),                # W_out (context half)
        pl.BlockSpec((H, A), const2),                # W_out (hidden half)
        pl.BlockSpec((1, A), const2),                # b_out
        pl.BlockSpec((A, TV), voc_map),              # W_out2 (streamed tiles)
        pl.BlockSpec((1, TV), voc_map),              # b_out2 (streamed tiles)
    ]
    out_specs = (
        pl.BlockSpec((B_pad, TV), voc_map),          # raw logits (lane-dense)
        pl.BlockSpec((B_pad, 1), const2),            # logsumexp
        pl.BlockSpec((B_pad, H), const2),            # h
        pl.BlockSpec((B_pad, H), const2),            # c
    )
    out_shape = (
        jax.ShapeDtypeStruct((B_pad, v_pad), f32),
        jax.ShapeDtypeStruct((B_pad, 1), f32),
        jax.ShapeDtypeStruct((B_pad, H), f32),
        jax.ShapeDtypeStruct((B_pad, H), f32),
    )
    scratch_shapes = [
        pltpu.VMEM((B_pad, 1), f32),    # running max (attention)
        pltpu.VMEM((B_pad, 1), f32),    # running sum (attention)
        pltpu.VMEM((B_pad, H), f32),    # context accumulator
        pltpu.VMEM((B_pad, A), f32),    # attention vector
        pltpu.VMEM((B_pad, H), f32),    # h (reused across grid steps)
        pltpu.VMEM((B_pad, 1), f32),    # running max (logsumexp)
        pltpu.VMEM((B_pad, 1), f32),    # running sum (logsumexp)
    ]

    flops = 2 * B_pad * (8 * H * H + 2 * T_pad * H + 2 * H * A + A * v_pad)
    transcendentals = B_pad * (6 * H + T_pad + v_pad + A + 4)
    bytes_accessed = int(sum(a.nbytes for a in (
        x_p, h_p, c_p, enc_p, len_p,
        prep['wih4'], prep['whh4'], prep['bg'], prep['w1'], prep['w2'],
        prep['b_out'], prep['w_v'], prep['b_v'])))
    bytes_accessed += 4 * (B_pad * v_pad + B_pad + 2 * B_pad * H)

    kernel = _make_kernel(NT, NV, TT, B_pad)

    logits, lse, h_out, c_out = pl.pallas_call(
        kernel,
        out_shape=out_shape,
        grid_spec=pltpu.PrefetchScalarGridSpec(
            num_scalar_prefetch=0,
            grid=(n_steps,),
            in_specs=in_specs,
            out_specs=out_specs,
            scratch_shapes=scratch_shapes),
        compiler_params=pltpu.CompilerParams(
            dimension_semantics=("arbitrary",),
            vmem_limit_bytes=32 * 1024 * 1024),
        cost_estimate=pl.CostEstimate(flops=int(flops),
                                      transcendentals=int(transcendentals),
                                      bytes_accessed=int(bytes_accessed)),
    )(x_p, h_p, c_p, len_p, enc_p,
      prep['wih4'], prep['whh4'], prep['bg'],
      prep['w1'], prep['w2'], prep['b_out'],
      prep['w_v'], prep['b_v'])

    # cheap second pass: finish the log-softmax and drop padding
    log_probs = (logits - lse)[:B, :V]
    return log_probs, h_out[:B], c_out[:B]


# -----------------------------------------------------------------------------
# Pure-JAX reference (mirrors the PyTorch module; same bf16 MXU-operand casts so
# the comparison tolerance reflects only implementation differences).
# -----------------------------------------------------------------------------
def _reference_forward(input_ids, prev_h, prev_c, enc, raw, mxu_dtype=MXU_DTYPE):
    f32 = jnp.float32
    H = prev_h.shape[1]

    def mm(a, b):
        return jnp.dot(a.astype(mxu_dtype), b.astype(mxu_dtype),
                       preferred_element_type=f32)

    x = raw['embedding'][input_ids]
    gates = (mm(x, raw['w_ih'].T) + raw['b_ih']
             + mm(prev_h, raw['w_hh'].T) + raw['b_hh'])
    i = jax.nn.sigmoid(gates[:, :H]); f = jax.nn.sigmoid(gates[:, H:2 * H])
    g = jnp.tanh(gates[:, 2 * H:3 * H]); o = jax.nn.sigmoid(gates[:, 3 * H:])
    c = f * prev_c + i * g
    h = o * jnp.tanh(c)

    scores = jnp.einsum('bth,bh->bt', enc.astype(mxu_dtype), h.astype(mxu_dtype),
                        preferred_element_type=f32)
    scores = jnp.where(scores == 0.0, NEG_BIG, scores)      # PyTorch-style mask
    p = jax.nn.softmax(scores, axis=1)
    ctx = jnp.einsum('bt,bth->bh', p.astype(mxu_dtype), enc.astype(mxu_dtype),
                     preferred_element_type=f32)
    att = jnp.tanh(mm(jnp.concatenate([ctx, h], axis=-1), raw['w_out'].T)
                   + raw['b_out'])
    logits = mm(att, raw['w_out2'].T) + raw['b_out2']
    return jax.nn.log_softmax(logits, axis=1), h, c


# -----------------------------------------------------------------------------
# Parameter init (matches the PyTorch module's init, incl. forget-gate bias fill)
# -----------------------------------------------------------------------------
def init_params(key, hidden_size, output_size, attention_vector_size,
                forget_bias=1.0):
    H, V, A = hidden_size, output_size, attention_vector_size
    ks = jax.random.split(key, 8)
    bound = 1.0 / np.sqrt(H)
    p = {
        'embedding': jax.random.normal(ks[0], (V, H), jnp.float32),
        'w_ih': jax.random.uniform(ks[1], (4 * H, H), jnp.float32, -bound, bound),
        'w_hh': jax.random.uniform(ks[2], (4 * H, H), jnp.float32, -bound, bound),
        'b_ih': jax.random.uniform(ks[3], (4 * H,), jnp.float32, -bound, bound),
        'b_hh': jax.random.uniform(ks[4], (4 * H,), jnp.float32, -bound, bound),
        'w_out': jax.random.uniform(ks[5], (A, 2 * H), jnp.float32, -bound, bound),
        'b_out': jnp.zeros((A,), jnp.float32),
        'w_out2': jax.random.uniform(ks[6], (V, A), jnp.float32, -bound, bound),
        'b_out2': jnp.zeros((V,), jnp.float32),
    }
    # forget-gate bias fill (PyTorch gate order: i, f, g, o)
    p['b_ih'] = p['b_ih'].at[H:2 * H].set(forget_bias)
    p['b_hh'] = p['b_hh'].at[H:2 * H].set(forget_bias)
    return p


if __name__ == "__main__":
    B, T, H, A, V = 2, 8, 32, 32, 64
    key = jax.random.PRNGKey(0)
    k_par, k_ids, k_h, k_c, k_enc = jax.random.split(key, 5)

    raw = init_params(k_par, H, V, A)
    prep = prepare_params(raw)            # one-time weight prep (hoisted)

    input_ids = jax.random.randint(k_ids, (B,), 0, V)
    prev_h = jax.random.normal(k_h, (B, H), jnp.float32)
    prev_c = jax.random.normal(k_c, (B, H), jnp.float32)

    # simulate pad_packed_sequence output: (B, T, H) with zero padding rows
    enc = jax.random.normal(k_enc, (B, T, H), jnp.float32)
    lengths = jnp.array([T, T - 3], jnp.int32)
    mask = (jnp.arange(T)[None, :] < lengths[:, None]).astype(jnp.float32)
    enc = enc * mask[:, :, None]

    log_probs, h, c = dot_atten_decoder_forward(
        prep, input_ids, prev_h, prev_c, enc, lengths)
    jax.block_until_ready((log_probs, h, c))

    # sanity check vs pure-JAX reference (bf16 MXU operands, f32 elementwise)
    ref_lp, ref_h, ref_c = _reference_forward(input_ids, prev_h, prev_c, enc, raw)
    np.testing.assert_allclose(np.asarray(log_probs), np.asarray(ref_lp),
                               rtol=2e-2, atol=2e-2)
    np.testing.assert_allclose(np.asarray(h), np.asarray(ref_h),
                               rtol=2e-2, atol=2e-2)
    np.testing.assert_allclose(np.asarray(c), np.asarray(ref_c),
                               rtol=2e-2, atol=2e-2)

    print("KERNEL_OK")
</pallas_src>

<mosaic_0001>
module attributes {stable_mosaic.version = 11 : i64} {
  func.func @kernel(%arg0: i32, %arg1: memref<8x32xbf16, #tpu.memory_space<vmem>>, %arg2: memref<8x32xf32, #tpu.memory_space<vmem>>, %arg3: memref<8x32xf32, #tpu.memory_space<vmem>>, %arg4: memref<8x1xi32, #tpu.memory_space<vmem>>, %arg5: memref<8x8x32xbf16, #tpu.memory_space<vmem>>, %arg6: memref<4x32x32xbf16, #tpu.memory_space<vmem>>, %arg7: memref<4x32x32xbf16, #tpu.memory_space<vmem>>, %arg8: memref<4x1x32xf32, #tpu.memory_space<vmem>>, %arg9: memref<32x32xbf16, #tpu.memory_space<vmem>>, %arg10: memref<32x32xbf16, #tpu.memory_space<vmem>>, %arg11: memref<1x32xf32, #tpu.memory_space<vmem>>, %arg12: memref<32x128xbf16, #tpu.memory_space<vmem>>, %arg13: memref<1x128xf32, #tpu.memory_space<vmem>>, %arg14: memref<8x128xf32, #tpu.memory_space<vmem>>, %arg15: memref<8x1xf32, #tpu.memory_space<vmem>>, %arg16: memref<8x32xf32, #tpu.memory_space<vmem>>, %arg17: memref<8x32xf32, #tpu.memory_space<vmem>>, %arg18: memref<8x1xf32, #tpu.memory_space<vmem>>, %arg19: memref<8x1xf32, #tpu.memory_space<vmem>>, %arg20: memref<8x32xf32, #tpu.memory_space<vmem>>, %arg21: memref<8x32xf32, #tpu.memory_space<vmem>>, %arg22: memref<8x32xf32, #tpu.memory_space<vmem>>, %arg23: memref<8x1xf32, #tpu.memory_space<vmem>>, %arg24: memref<8x1xf32, #tpu.memory_space<vmem>>) attributes {dimension_semantics = [#tpu.dimension_semantics<arbitrary>], iteration_bounds = array<i64: 2>, scalar_prefetch = 0 : i64, scratch_operands = 7 : i64, tpu.core_type = #tpu.core_type<tc>, window_params = [{pipeline_mode = #tpu.pipeline_mode<synchronous>, transform_indices = @transform_0, window_bounds = array<i64: 8, 32>}, {pipeline_mode = #tpu.pipeline_mode<synchronous>, transform_indices = @transform_1, window_bounds = array<i64: 8, 32>}, {pipeline_mode = #tpu.pipeline_mode<synchronous>, transform_indices = @transform_2, window_bounds = array<i64: 8, 32>}, {pipeline_mode = #tpu.pipeline_mode<synchronous>, transform_indices = @transform_3, window_bounds = array<i64: 8, 1>}, {transform_indices = @transform_4, window_bounds = array<i64: 8, 8, 32>}, {pipeline_mode = #tpu.pipeline_mode<synchronous>, transform_indices = @transform_5, window_bounds = array<i64: 4, 32, 32>}, {pipeline_mode = #tpu.pipeline_mode<synchronous>, transform_indices = @transform_6, window_bounds = array<i64: 4, 32, 32>}, {pipeline_mode = #tpu.pipeline_mode<synchronous>, transform_indices = @transform_7, window_bounds = array<i64: 4, 1, 32>}, {pipeline_mode = #tpu.pipeline_mode<synchronous>, transform_indices = @transform_8, window_bounds = array<i64: 32, 32>}, {pipeline_mode = #tpu.pipeline_mode<synchronous>, transform_indices = @transform_9, window_bounds = array<i64: 32, 32>}, {pipeline_mode = #tpu.pipeline_mode<synchronous>, transform_indices = @transform_10, window_bounds = array<i64: 1, 32>}, {transform_indices = @transform_11, window_bounds = array<i64: 32, 128>}, {transform_indices = @transform_12, window_bounds = array<i64: 1, 128>}, {transform_indices = @transform_13, window_bounds = array<i64: 8, 128>}, {pipeline_mode = #tpu.pipeline_mode<synchronous>, transform_indices = @transform_14, window_bounds = array<i64: 8, 1>}, {pipeline_mode = #tpu.pipeline_mode<synchronous>, transform_indices = @transform_15, window_bounds = array<i64: 8, 32>}, {pipeline_mode = #tpu.pipeline_mode<synchronous>, transform_indices = @transform_16, window_bounds = array<i64: 8, 32>}]} {
    %c0_i32 = arith.constant 0 : i32
    %0 = arith.cmpi eq, %arg0, %c0_i32 : i32
    %1 = arith.extui %0 : i1 to i32
    %c0_i32_0 = arith.constant 0 : i32
    %2 = arith.cmpi ne, %1, %c0_i32_0 : i32
    scf.if %2 {
      %c0 = arith.constant 0 : index
      %c0_8 = arith.constant 0 : index
      %15 = vector.load %arg1[%c0, %c0_8] : memref<8x32xbf16, #tpu.memory_space<vmem>>, vector<8x32xbf16>
      %c0_9 = arith.constant 0 : index
      %c0_10 = arith.constant 0 : index
      %16 = vector.load %arg2[%c0_9, %c0_10] : memref<8x32xf32, #tpu.memory_space<vmem>>, vector<8x32xf32>
      %c0_11 = arith.constant 0 : index
      %c0_12 = arith.constant 0 : index
      %17 = vector.load %arg3[%c0_11, %c0_12] : memref<8x32xf32, #tpu.memory_space<vmem>>, vector<8x32xf32>
      %18 = arith.truncf %16 : vector<8x32xf32> to vector<8x32xbf16>
      %c0_13 = arith.constant 0 : index
      %c0_14 = arith.constant 0 : index
      %c0_15 = arith.constant 0 : index
      %19 = vector.load %arg6[%c0_13, %c0_14, %c0_15] : memref<4x32x32xbf16, #tpu.memory_space<vmem>>, vector<1x32x32xbf16>
      %20 = vector.shape_cast %19 : vector<1x32x32xbf16> to vector<32x32xbf16>
      %cst = arith.constant dense<0.000000e+00> : vector<8x32xf32>
      %21 = tpu.matmul %15, %20, %cst {dimension_numbers = #tpu.dot_dimension_numbers<[1], [0], [0], [1], [0, 0, 1, 1], [], []>} : vector<8x32xbf16>, vector<32x32xbf16>, vector<8x32xf32> -> vector<8x32xf32>
      %c0_16 = arith.constant 0 : index
      %c0_17 = arith.constant 0 : index
      %c0_18 = arith.constant 0 : index
      %22 = vector.load %arg7[%c0_16, %c0_17, %c0_18] : memref<4x32x32xbf16, #tpu.memory_space<vmem>>, vector<1x32x32xbf16>
      %23 = vector.shape_cast %22 : vector<1x32x32xbf16> to vector<32x32xbf16>
      %cst_19 = arith.constant dense<0.000000e+00> : vector<8x32xf32>
      %24 = tpu.matmul %18, %23, %cst_19 {dimension_numbers = #tpu.dot_dimension_numbers<[1], [0], [0], [1], [0, 0, 1, 1], [], []>} : vector<8x32xbf16>, vector<32x32xbf16>, vector<8x32xf32> -> vector<8x32xf32>
      %25 = arith.addf %21, %24 : vector<8x32xf32>
      %c0_20 = arith.constant 0 : index
      %c0_21 = arith.constant 0 : index
      %c0_22 = arith.constant 0 : index
      %26 = vector.load %arg8[%c0_20, %c0_21, %c0_22] : memref<4x1x32xf32, #tpu.memory_space<vmem>>, vector<1x1x32xf32>
      %27 = vector.shape_cast %26 : vector<1x1x32xf32> to vector<1x32xf32>
      %28 = vector.broadcast %27 : vector<1x32xf32> to vector<8x32xf32>
      %29 = arith.addf %25, %28 : vector<8x32xf32>
      %30 = arith.negf %29 : vector<8x32xf32>
      %31 = math.exp %30 : vector<8x32xf32>
      %cst_23 = arith.constant 1.000000e+00 : f32
      %32 = vector.broadcast %cst_23 : f32 to vector<8x32xf32>
      %33 = arith.addf %32, %31 : vector<8x32xf32>
      %34 = arith.divf %32, %33 : vector<8x32xf32>
      %c1 = arith.constant 1 : index
      %c0_24 = arith.constant 0 : index
      %c0_25 = arith.constant 0 : index
      %35 = vector.load %arg6[%c1, %c0_24, %c0_25] : memref<4x32x32xbf16, #tpu.memory_space<vmem>>, vector<1x32x32xbf16>
      %36 = vector.shape_cast %35 : vector<1x32x32xbf16> to vector<32x32xbf16>
      %cst_26 = arith.constant dense<0.000000e+00> : vector<8x32xf32>
      %37 = tpu.matmul %15, %36, %cst_26 {dimension_numbers = #tpu.dot_dimension_numbers<[1], [0], [0], [1], [0, 0, 1, 1], [], []>} : vector<8x32xbf16>, vector<32x32xbf16>, vector<8x32xf32> -> vector<8x32xf32>
      %c1_27 = arith.constant 1 : index
      %c0_28 = arith.constant 0 : index
      %c0_29 = arith.constant 0 : index
      %38 = vector.load %arg7[%c1_27, %c0_28, %c0_29] : memref<4x32x32xbf16, #tpu.memory_space<vmem>>, vector<1x32x32xbf16>
      %39 = vector.shape_cast %38 : vector<1x32x32xbf16> to vector<32x32xbf16>
      %cst_30 = arith.constant dense<0.000000e+00> : vector<8x32xf32>
      %40 = tpu.matmul %18, %39, %cst_30 {dimension_numbers = #tpu.dot_dimension_numbers<[1], [0], [0], [1], [0, 0, 1, 1], [], []>} : vector<8x32xbf16>, vector<32x32xbf16>, vector<8x32xf32> -> vector<8x32xf32>
      %41 = arith.addf %37, %40 : vector<8x32xf32>
      %c1_31 = arith.constant 1 : index
      %c0_32 = arith.constant 0 : index
      %c0_33 = arith.constant 0 : index
      %42 = vector.load %arg8[%c1_31, %c0_32, %c0_33] : memref<4x1x32xf32, #tpu.memory_space<vmem>>, vector<1x1x32xf32>
      %43 = vector.shape_cast %42 : vector<1x1x32xf32> to vector<1x32xf32>
      %44 = vector.broadcast %43 : vector<1x32xf32> to vector<8x32xf32>
      %45 = arith.addf %41, %44 : vector<8x32xf32>
      %46 = arith.negf %45 : vector<8x32xf32>
      %47 = math.exp %46 : vector<8x32xf32>
      %cst_34 = arith.constant 1.000000e+00 : f32
      %48 = vector.broadcast %cst_34 : f32 to vector<8x32xf32>
      %49 = arith.addf %48, %47 : vector<8x32xf32>
      %50 = arith.divf %48, %49 : vector<8x32xf32>
      %c2 = arith.constant 2 : index
      %c0_35 = arith.constant 0 : index
      %c0_36 = arith.constant 0 : index
      %51 = vector.load %arg6[%c2, %c0_35, %c0_36] : memref<4x32x32xbf16, #tpu.memory_space<vmem>>, vector<1x32x32xbf16>
      %52 = vector.shape_cast %51 : vector<1x32x32xbf16> to vector<32x32xbf16>
      %cst_37 = arith.constant dense<0.000000e+00> : vector<8x32xf32>
      %53 = tpu.matmul %15, %52, %cst_37 {dimension_numbers = #tpu.dot_dimension_numbers<[1], [0], [0], [1], [0, 0, 1, 1], [], []>} : vector<8x32xbf16>, vector<32x32xbf16>, vector<8x32xf32> -> vector<8x32xf32>
      %c2_38 = arith.constant 2 : index
      %c0_39 = arith.constant 0 : index
      %c0_40 = arith.constant 0 : index
      %54 = vector.load %arg7[%c2_38, %c0_39, %c0_40] : memref<4x32x32xbf16, #tpu.memory_space<vmem>>, vector<1x32x32xbf16>
      %55 = vector.shape_cast %54 : vector<1x32x32xbf16> to vector<32x32xbf16>
      %cst_41 = arith.constant dense<0.000000e+00> : vector<8x32xf32>
      %56 = tpu.matmul %18, %55, %cst_41 {dimension_numbers = #tpu.dot_dimension_numbers<[1], [0], [0], [1], [0, 0, 1, 1], [], []>} : vector<8x32xbf16>, vector<32x32xbf16>, vector<8x32xf32> -> vector<8x32xf32>
      %57 = arith.addf %53, %56 : vector<8x32xf32>
      %c2_42 = arith.constant 2 : index
      %c0_43 = arith.constant 0 : index
      %c0_44 = arith.constant 0 : index
      %58 = vector.load %arg8[%c2_42, %c0_43, %c0_44] : memref<4x1x32xf32, #tpu.memory_space<vmem>>, vector<1x1x32xf32>
      %59 = vector.shape_cast %58 : vector<1x1x32xf32> to vector<1x32xf32>
      %60 = vector.broadcast %59 : vector<1x32xf32> to vector<8x32xf32>
      %61 = arith.addf %57, %60 : vector<8x32xf32>
      %62 = math.tanh %61 : vector<8x32xf32>
      %c3 = arith.constant 3 : index
      %c0_45 = arith.constant 0 : index
      %c0_46 = arith.constant 0 : index
      %63 = vector.load %arg6[%c3, %c0_45, %c0_46] : memref<4x32x32xbf16, #tpu.memory_space<vmem>>, vector<1x32x32xbf16>
      %64 = vector.shape_cast %63 : vector<1x32x32xbf16> to vector<32x32xbf16>
      %cst_47 = arith.constant dense<0.000000e+00> : vector<8x32xf32>
      %65 = tpu.matmul %15, %64, %cst_47 {dimension_numbers = #tpu.dot_dimension_numbers<[1], [0], [0], [1], [0, 0, 1, 1], [], []>} : vector<8x32xbf16>, vector<32x32xbf16>, vector<8x32xf32> -> vector<8x32xf32>
      %c3_48 = arith.constant 3 : index
      %c0_49 = arith.constant 0 : index
      %c0_50 = arith.constant 0 : index
      %66 = vector.load %arg7[%c3_48, %c0_49, %c0_50] : memref<4x32x32xbf16, #tpu.memory_space<vmem>>, vector<1x32x32xbf16>
      %67 = vector.shape_cast %66 : vector<1x32x32xbf16> to vector<32x32xbf16>
      %cst_51 = arith.constant dense<0.000000e+00> : vector<8x32xf32>
      %68 = tpu.matmul %18, %67, %cst_51 {dimension_numbers = #tpu.dot_dimension_numbers<[1], [0], [0], [1], [0, 0, 1, 1], [], []>} : vector<8x32xbf16>, vector<32x32xbf16>, vector<8x32xf32> -> vector<8x32xf32>
      %69 = arith.addf %65, %68 : vector<8x32xf32>
      %c3_52 = arith.constant 3 : index
      %c0_53 = arith.constant 0 : index
      %c0_54 = arith.constant 0 : index
      %70 = vector.load %arg8[%c3_52, %c0_53, %c0_54] : memref<4x1x32xf32, #tpu.memory_space<vmem>>, vector<1x1x32xf32>
      %71 = vector.shape_cast %70 : vector<1x1x32xf32> to vector<1x32xf32>
      %72 = vector.broadcast %71 : vector<1x32xf32> to vector<8x32xf32>
      %73 = arith.addf %69, %72 : vector<8x32xf32>
      %74 = arith.negf %73 : vector<8x32xf32>
      %75 = math.exp %74 : vector<8x32xf32>
      %cst_55 = arith.constant 1.000000e+00 : f32
      %76 = vector.broadcast %cst_55 : f32 to vector<8x32xf32>
      %77 = arith.addf %76, %75 : vector<8x32xf32>
      %78 = arith.divf %76, %77 : vector<8x32xf32>
      %79 = arith.mulf %50, %17 : vector<8x32xf32>
      %80 = arith.mulf %34, %62 : vector<8x32xf32>
      %81 = arith.addf %79, %80 : vector<8x32xf32>
      %82 = math.tanh %81 : vector<8x32xf32>
      %83 = arith.mulf %78, %82 : vector<8x32xf32>
      %c0_56 = arith.constant 0 : index
      %c0_57 = arith.constant 0 : index
      %84 = vector.load %arg22[%c0_56, %c0_57] : memref<8x32xf32, #tpu.memory_space<vmem>>, vector<8x32xf32>
      tpu.vector_store %arg22[%c0_56, %c0_57], %83 {strides = array<i32>} : memref<8x32xf32, #tpu.memory_space<vmem>>, vector<8x32xf32>,
      %c0_58 = arith.constant 0 : index
      %c0_59 = arith.constant 0 : index
      %85 = vector.load %arg16[%c0_58, %c0_59] : memref<8x32xf32, #tpu.memory_space<vmem>>, vector<8x32xf32>
      tpu.vector_store %arg16[%c0_58, %c0_59], %83 {strides = array<i32>} : memref<8x32xf32, #tpu.memory_space<vmem>>, vector<8x32xf32>,
      %c0_60 = arith.constant 0 : index
      %c0_61 = arith.constant 0 : index
      %86 = vector.load %arg17[%c0_60, %c0_61] : memref<8x32xf32, #tpu.memory_space<vmem>>, vector<8x32xf32>
      tpu.vector_store %arg17[%c0_60, %c0_61], %81 {strides = array<i32>} : memref<8x32xf32, #tpu.memory_space<vmem>>, vector<8x32xf32>,
      %cst_62 = arith.constant 0xFF800000 : f32
      %87 = vector.broadcast %cst_62 : f32 to vector<8x1xf32>
      %c0_63 = arith.constant 0 : index
      %c0_64 = arith.constant 0 : index
      %88 = vector.load %arg18[%c0_63, %c0_64] : memref<8x1xf32, #tpu.memory_space<vmem>>, vector<8x1xf32>
      tpu.vector_store %arg18[%c0_63, %c0_64], %87 {strides = array<i32>} : memref<8x1xf32, #tpu.memory_space<vmem>>, vector<8x1xf32>,
      %cst_65 = arith.constant 0.000000e+00 : f32
      %89 = vector.broadcast %cst_65 : f32 to vector<8x1xf32>
      %c0_66 = arith.constant 0 : index
      %c0_67 = arith.constant 0 : index
      %90 = vector.load %arg19[%c0_66, %c0_67] : memref<8x1xf32, #tpu.memory_space<vmem>>, vector<8x1xf32>
      tpu.vector_store %arg19[%c0_66, %c0_67], %89 {strides = array<i32>} : memref<8x1xf32, #tpu.memory_space<vmem>>, vector<8x1xf32>,
      %cst_68 = arith.constant 0.000000e+00 : f32
      %91 = vector.broadcast %cst_68 : f32 to vector<8x32xf32>
      %c0_69 = arith.constant 0 : index
      %c0_70 = arith.constant 0 : index
      %92 = vector.load %arg20[%c0_69, %c0_70] : memref<8x32xf32, #tpu.memory_space<vmem>>, vector<8x32xf32>
      tpu.vector_store %arg20[%c0_69, %c0_70], %91 {strides = array<i32>} : memref<8x32xf32, #tpu.memory_space<vmem>>, vector<8x32xf32>,
      %cst_71 = arith.constant 0xFF800000 : f32
      %93 = vector.broadcast %cst_71 : f32 to vector<8x1xf32>
      %c0_72 = arith.constant 0 : index
      %c0_73 = arith.constant 0 : index
      %94 = vector.load %arg23[%c0_72, %c0_73] : memref<8x1xf32, #tpu.memory_space<vmem>>, vector<8x1xf32>
      tpu.vector_store %arg23[%c0_72, %c0_73], %93 {strides = array<i32>} : memref<8x1xf32, #tpu.memory_space<vmem>>, vector<8x1xf32>,
      %cst_74 = arith.constant 0.000000e+00 : f32
      %95 = vector.broadcast %cst_74 : f32 to vector<8x1xf32>
      %c0_75 = arith.constant 0 : index
      %c0_76 = arith.constant 0 : index
      %96 = vector.load %arg24[%c0_75, %c0_76] : memref<8x1xf32, #tpu.memory_space<vmem>>, vector<8x1xf32>
      tpu.vector_store %arg24[%c0_75, %c0_76], %95 {strides = array<i32>} : memref<8x1xf32, #tpu.memory_space<vmem>>, vector<8x1xf32>,
    } else {
    }
    %c1_i32 = arith.constant 1 : i32
    %3 = arith.cmpi slt, %arg0, %c1_i32 : i32
    %4 = arith.extui %3 : i1 to i32
    %c0_i32_1 = arith.constant 0 : i32
    %5 = arith.cmpi ne, %4, %c0_i32_1 : i32
    scf.if %5 {
      %c0 = arith.constant 0 : index
      %c0_8 = arith.constant 0 : index
      %15 = vector.load %arg22[%c0, %c0_8] : memref<8x32xf32, #tpu.memory_space<vmem>>, vector<8x32xf32>
      %c0_9 = arith.constant 0 : index
      %c0_10 = arith.constant 0 : index
      %c0_11 = arith.constant 0 : index
      %16 = vector.load %arg5[%c0_9, %c0_10, %c0_11] : memref<8x8x32xbf16, #tpu.memory_space<vmem>>, vector<8x8x32xbf16>
      %17 = arith.extf %16 : vector<8x8x32xbf16> to vector<8x8x32xf32>
      %18 = vector.shape_cast %15 : vector<8x32xf32> to vector<8x1x32xf32>
      %19 = vector.broadcast %18 : vector<8x1x32xf32> to vector<8x8x32xf32>
      %20 = arith.mulf %17, %19 : vector<8x8x32xf32>
      %cst = arith.constant dense<0.000000e+00> : vector<8x8xf32>
      %21 = vector.multi_reduction <add>, %20, %cst [2] : vector<8x8x32xf32> to vector<8x8xf32>
      %c8_i32 = arith.constant 8 : i32
      %22 = arith.muli %arg0, %c8_i32 : i32
      %23 = tpu.iota {dimensions = array<i32: 1>} : vector<8x8xi32>
      %24 = vector.broadcast %22 : i32 to vector<8x8xi32>
      %25 = arith.addi %24, %23 : vector<8x8xi32>
      %c0_12 = arith.constant 0 : index
      %c0_13 = arith.constant 0 : index
      %26 = vector.load %arg4[%c0_12, %c0_13] : memref<8x1xi32, #tpu.memory_space<vmem>>, vector<8x1xi32>
      %27 = vector.broadcast %26 : vector<8x1xi32> to vector<8x8xi32>
      %28 = arith.cmpi slt, %25, %27 : vector<8x8xi32>
      %cst_14 = arith.constant -9.99999979E+10 : f32
      %29 = vector.broadcast %cst_14 : f32 to vector<8x8xf32>
      %30 = arith.select %28, %21, %29 : vector<8x8xi1>, vector<8x8xf32>
      %c0_15 = arith.constant 0 : index
      %c0_16 = arith.constant 0 : index
      %31 = vector.load %arg18[%c0_15, %c0_16] : memref<8x1xf32, #tpu.memory_space<vmem>>, vector<8x1xf32>
      %cst_17 = arith.constant dense<0xFF800000> : vector<8xf32>
      %32 = vector.multi_reduction <maximumf>, %30, %cst_17 [1] : vector<8x8xf32> to vector<8xf32>
      %33 = vector.shape_cast %32 : vector<8xf32> to vector<8x1xf32>
      %34 = arith.maximumf %31, %33 : vector<8x1xf32>
      %35 = arith.subf %31, %34 : vector<8x1xf32>
      %36 = math.exp %35 : vector<8x1xf32>
      %37 = vector.broadcast %34 : vector<8x1xf32> to vector<8x8xf32>
      %38 = arith.subf %30, %37 : vector<8x8xf32>
      %39 = math.exp %38 : vector<8x8xf32>
      %c0_18 = arith.constant 0 : index
      %c0_19 = arith.constant 0 : index
      %40 = vector.load %arg19[%c0_18, %c0_19] : memref<8x1xf32, #tpu.memory_space<vmem>>, vector<8x1xf32>
      %41 = arith.mulf %36, %40 : vector<8x1xf32>
      %cst_20 = arith.constant dense<0.000000e+00> : vector<8xf32>
      %42 = vector.multi_reduction <add>, %39, %cst_20 [1] : vector<8x8xf32> to vector<8xf32>
      %43 = vector.shape_cast %42 : vector<8xf32> to vector<8x1xf32>
      %44 = arith.addf %41, %43 : vector<8x1xf32>
      %c0_21 = arith.constant 0 : index
      %c0_22 = arith.constant 0 : index
      %45 = vector.load %arg19[%c0_21, %c0_22] : memref<8x1xf32, #tpu.memory_space<vmem>>, vector<8x1xf32>
      tpu.vector_store %arg19[%c0_21, %c0_22], %44 {strides = array<i32>} : memref<8x1xf32, #tpu.memory_space<vmem>>, vector<8x1xf32>,
      %46 = vector.shape_cast %39 : vector<8x8xf32> to vector<8x8x1xf32>
      %47 = vector.broadcast %46 : vector<8x8x1xf32> to vector<8x8x32xf32>
      %48 = arith.mulf %47, %17 : vector<8x8x32xf32>
      %cst_23 = arith.constant dense<0.000000e+00> : vector<8x32xf32>
      %49 = vector.multi_reduction <add>, %48, %cst_23 [1] : vector<8x8x32xf32> to vector<8x32xf32>
      %c0_24 = arith.constant 0 : index
      %c0_25 = arith.constant 0 : index
      %50 = vector.load %arg20[%c0_24, %c0_25] : memref<8x32xf32, #tpu.memory_space<vmem>>, vector<8x32xf32>
      %51 = vector.broadcast %36 : vector<8x1xf32> to vector<8x32xf32>
      %52 = arith.mulf %51, %50 : vector<8x32xf32>
      %53 = arith.addf %52, %49 : vector<8x32xf32>
      %c0_26 = arith.constant 0 : index
      %c0_27 = arith.constant 0 : index
      %54 = vector.load %arg20[%c0_26, %c0_27] : memref<8x32xf32, #tpu.memory_space<vmem>>, vector<8x32xf32>
      tpu.vector_store %arg20[%c0_26, %c0_27], %53 {strides = array<i32>} : memref<8x32xf32, #tpu.memory_space<vmem>>, vector<8x32xf32>,
      %c0_28 = arith.constant 0 : index
      %c0_29 = arith.constant 0 : index
      %55 = vector.load %arg18[%c0_28, %c0_29] : memref<8x1xf32, #tpu.memory_space<vmem>>, vector<8x1xf32>
      tpu.vector_store %arg18[%c0_28, %c0_29], %34 {strides = array<i32>} : memref<8x1xf32, #tpu.memory_space<vmem>>, vector<8x1xf32>,
    } else {
    }
    %c0_i32_2 = arith.constant 0 : i32
    %6 = arith.cmpi eq, %arg0, %c0_i32_2 : i32
    %7 = arith.extui %6 : i1 to i32
    %c0_i32_3 = arith.constant 0 : i32
    %8 = arith.cmpi ne, %7, %c0_i32_3 : i32
    scf.if %8 {
      %c0 = arith.constant 0 : index
      %c0_8 = arith.constant 0 : index
      %15 = vector.load %arg20[%c0, %c0_8] : memref<8x32xf32, #tpu.memory_space<vmem>>, vector<8x32xf32>
      %c0_9 = arith.constant 0 : index
      %c0_10 = arith.constant 0 : index
      %16 = vector.load %arg19[%c0_9, %c0_10] : memref<8x1xf32, #tpu.memory_space<vmem>>, vector<8x1xf32>
      %17 = vector.broadcast %16 : vector<8x1xf32> to vector<8x32xf32>
      %18 = arith.divf %15, %17 : vector<8x32xf32>
      %c0_11 = arith.constant 0 : index
      %c0_12 = arith.constant 0 : index
      %19 = vector.load %arg22[%c0_11, %c0_12] : memref<8x32xf32, #tpu.memory_space<vmem>>, vector<8x32xf32>
      %20 = arith.truncf %18 : vector<8x32xf32> to vector<8x32xbf16>
      %c0_13 = arith.constant 0 : index
      %c0_14 = arith.constant 0 : index
      %21 = vector.load %arg9[%c0_13, %c0_14] : memref<32x32xbf16, #tpu.memory_space<vmem>>, vector<32x32xbf16>
      %cst = arith.constant dense<0.000000e+00> : vector<8x32xf32>
      %22 = tpu.matmul %20, %21, %cst {dimension_numbers = #tpu.dot_dimension_numbers<[1], [0], [0], [1], [0, 0, 1, 1], [], []>} : vector<8x32xbf16>, vector<32x32xbf16>, vector<8x32xf32> -> vector<8x32xf32>
      %23 = arith.truncf %19 : vector<8x32xf32> to vector<8x32xbf16>
      %c0_15 = arith.constant 0 : index
      %c0_16 = arith.constant 0 : index
      %24 = vector.load %arg10[%c0_15, %c0_16] : memref<32x32xbf16, #tpu.memory_space<vmem>>, vector<32x32xbf16>
      %cst_17 = arith.constant dense<0.000000e+00> : vector<8x32xf32>
      %25 = tpu.matmul %23, %24, %cst_17 {dimension_numbers = #tpu.dot_dimension_numbers<[1], [0], [0], [1], [0, 0, 1, 1], [], []>} : vector<8x32xbf16>, vector<32x32xbf16>, vector<8x32xf32> -> vector<8x32xf32>
      %26 = arith.addf %22, %25 : vector<8x32xf32>
      %c0_18 = arith.constant 0 : index
      %c0_19 = arith.constant 0 : index
      %27 = vector.load %arg11[%c0_18, %c0_19] : memref<1x32xf32, #tpu.memory_space<vmem>>, vector<1x32xf32>
      %28 = vector.broadcast %27 : vector<1x32xf32> to vector<8x32xf32>
      %29 = arith.addf %26, %28 : vector<8x32xf32>
      %30 = math.tanh %29 : vector<8x32xf32>
      %c0_20 = arith.constant 0 : index
      %c0_21 = arith.constant 0 : index
      %31 = vector.load %arg21[%c0_20, %c0_21] : memref<8x32xf32, #tpu.memory_space<vmem>>, vector<8x32xf32>
      tpu.vector_store %arg21[%c0_20, %c0_21], %30 {strides = array<i32>} : memref<8x32xf32, #tpu.memory_space<vmem>>, vector<8x32xf32>,
    } else {
    }
    %c1_i32_4 = arith.constant 1 : i32
    %9 = arith.cmpi sge, %arg0, %c1_i32_4 : i32
    %10 = arith.extui %9 : i1 to i32
    %c0_i32_5 = arith.constant 0 : i32
    %11 = arith.cmpi ne, %10, %c0_i32_5 : i32
    scf.if %11 {
      %c0 = arith.constant 0 : index
      %c0_8 = arith.constant 0 : index
      %15 = vector.load %arg21[%c0, %c0_8] : memref<8x32xf32, #tpu.memory_space<vmem>>, vector<8x32xf32>
      %16 = arith.truncf %15 : vector<8x32xf32> to vector<8x32xbf16>
      %c0_9 = arith.constant 0 : index
      %c0_10 = arith.constant 0 : index
      %17 = vector.load %arg12[%c0_9, %c0_10] : memref<32x128xbf16, #tpu.memory_space<vmem>>, vector<32x128xbf16>
      %cst = arith.constant dense<0.000000e+00> : vector<8x128xf32>
      %18 = tpu.matmul %16, %17, %cst {dimension_numbers = #tpu.dot_dimension_numbers<[1], [0], [0], [1], [0, 0, 1, 1], [], []>} : vector<8x32xbf16>, vector<32x128xbf16>, vector<8x128xf32> -> vector<8x128xf32>
      %c0_11 = arith.constant 0 : index
      %c0_12 = arith.constant 0 : index
      %19 = vector.load %arg13[%c0_11, %c0_12] : memref<1x128xf32, #tpu.memory_space<vmem>>, vector<1x128xf32>
      %20 = vector.broadcast %19 : vector<1x128xf32> to vector<8x128xf32>
      %21 = arith.addf %18, %20 : vector<8x128xf32>
      %c0_13 = arith.constant 0 : index
      %c0_14 = arith.constant 0 : index
      %22 = vector.load %arg14[%c0_13, %c0_14] : memref<8x128xf32, #tpu.memory_space<vmem>>, vector<8x128xf32>
      tpu.vector_store %arg14[%c0_13, %c0_14], %21 {strides = array<i32>} : memref<8x128xf32, #tpu.memory_space<vmem>>, vector<8x128xf32>,
      %c0_15 = arith.constant 0 : index
      %c0_16 = arith.constant 0 : index
      %23 = vector.load %arg23[%c0_15, %c0_16] : memref<8x1xf32, #tpu.memory_space<vmem>>, vector<8x1xf32>
      %cst_17 = arith.constant dense<0xFF800000> : vector<8xf32>
      %24 = vector.multi_reduction <maximumf>, %21, %cst_17 [1] : vector<8x128xf32> to vector<8xf32>
      %25 = vector.shape_cast %24 : vector<8xf32> to vector<8x1xf32>
      %26 = arith.maximumf %23, %25 : vector<8x1xf32>
      %27 = arith.subf %23, %26 : vector<8x1xf32>
      %28 = math.exp %27 : vector<8x1xf32>
      %c0_18 = arith.constant 0 : index
      %c0_19 = arith.constant 0 : index
      %29 = vector.load %arg24[%c0_18, %c0_19] : memref<8x1xf32, #tpu.memory_space<vmem>>, vector<8x1xf32>
      %30 = arith.mulf %28, %29 : vector<8x1xf32>
      %31 = vector.broadcast %26 : vector<8x1xf32> to vector<8x128xf32>
      %32 = arith.subf %21, %31 : vector<8x128xf32>
      %33 = math.exp %32 : vector<8x128xf32>
      %cst_20 = arith.constant dense<0.000000e+00> : vector<8xf32>
      %34 = vector.multi_reduction <add>, %33, %cst_20 [1] : vector<8x128xf32> to vector<8xf32>
      %35 = vector.shape_cast %34 : vector<8xf32> to vector<8x1xf32>
      %36 = arith.addf %30, %35 : vector<8x1xf32>
      %c0_21 = arith.constant 0 : index
      %c0_22 = arith.constant 0 : index
      %37 = vector.load %arg24[%c0_21, %c0_22] : memref<8x1xf32, #tpu.memory_space<vmem>>, vector<8x1xf32>
      tpu.vector_store %arg24[%c0_21, %c0_22], %36 {strides = array<i32>} : memref<8x1xf32, #tpu.memory_space<vmem>>, vector<8x1xf32>,
      %c0_23 = arith.constant 0 : index
      %c0_24 = arith.constant 0 : index
      %38 = vector.load %arg23[%c0_23, %c0_24] : memref<8x1xf32, #tpu.memory_space<vmem>>, vector<8x1xf32>
      tpu.vector_store %arg23[%c0_23, %c0_24], %26 {strides = array<i32>} : memref<8x1xf32, #tpu.memory_space<vmem>>, vector<8x1xf32>,
    } else {
    }
    %c1_i32_6 = arith.constant 1 : i32
    %12 = arith.cmpi eq, %arg0, %c1_i32_6 : i32
    %13 = arith.extui %12 : i1 to i32
    %c0_i32_7 = arith.constant 0 : i32
    %14 = arith.cmpi ne, %13, %c0_i32_7 : i32
    scf.if %14 {
      %c0 = arith.constant 0 : index
      %c0_8 = arith.constant 0 : index
      %15 = vector.load %arg23[%c0, %c0_8] : memref<8x1xf32, #tpu.memory_space<vmem>>, vector<8x1xf32>
      %c0_9 = arith.constant 0 : index
      %c0_10 = arith.constant 0 : index
      %16 = vector.load %arg24[%c0_9, %c0_10] : memref<8x1xf32, #tpu.memory_space<vmem>>, vector<8x1xf32>
      %17 = math.log %16 : vector<8x1xf32>
      %18 = arith.addf %15, %17 : vector<8x1xf32>
      %c0_11 = arith.constant 0 : index
      %c0_12 = arith.constant 0 : index
      %19 = vector.load %arg15[%c0_11, %c0_12] : memref<8x1xf32, #tpu.memory_space<vmem>>, vector<8x1xf32>
      tpu.vector_store %arg15[%c0_11, %c0_12], %18 {strides = array<i32>} : memref<8x1xf32, #tpu.memory_space<vmem>>, vector<8x1xf32>,
    } else {
    }
    return
  }
  func.func @transform_0(%arg0: i32) -> (i32, i32) {
    %c0_i32 = arith.constant 0 : i32
    %c0_i32_0 = arith.constant 0 : i32
    %c0_i32_1 = arith.constant 0 : i32
    return %c0_i32, %c0_i32_0 : i32, i32
  }
  func.func @transform_1(%arg0: i32) -> (i32, i32) {
    %c0_i32 = arith.constant 0 : i32
    %c0_i32_0 = arith.constant 0 : i32
    %c0_i32_1 = arith.constant 0 : i32
    return %c0_i32, %c0_i32_0 : i32, i32
  }
  func.func @transform_2(%arg0: i32) -> (i32, i32) {
    %c0_i32 = arith.constant 0 : i32
    %c0_i32_0 = arith.constant 0 : i32
    %c0_i32_1 = arith.constant 0 : i32
    return %c0_i32, %c0_i32_0 : i32, i32
  }
  func.func @transform_3(%arg0: i32) -> (i32, i32) {
    %c0_i32 = arith.constant 0 : i32
    %c0_i32_0 = arith.constant 0 : i32
    %c0_i32_1 = arith.constant 0 : i32
    return %c0_i32, %c0_i32_0 : i32, i32
  }
  func.func @transform_4(%arg0: i32) -> (i32, i32, i32) {
    %c0_i32 = arith.constant 0 : i32
    %0 = arith.minsi %arg0, %c0_i32 : i32
    %c0_i32_0 = arith.constant 0 : i32
    %c0_i32_1 = arith.constant 0 : i32
    %c0_i32_2 = arith.constant 0 : i32
    return %c0_i32_0, %0, %c0_i32_1 : i32, i32, i32
  }
  func.func @transform_5(%arg0: i32) -> (i32, i32, i32) {
    %c0_i32 = arith.constant 0 : i32
    %c0_i32_0 = arith.constant 0 : i32
    %c0_i32_1 = arith.constant 0 : i32
    %c0_i32_2 = arith.constant 0 : i32
    return %c0_i32, %c0_i32_0, %c0_i32_1 : i32, i32, i32
  }
  func.func @transform_6(%arg0: i32) -> (i32, i32, i32) {
    %c0_i32 = arith.constant 0 : i32
    %c0_i32_0 = arith.constant 0 : i32
    %c0_i32_1 = arith.constant 0 : i32
    %c0_i32_2 = arith.constant 0 : i32
    return %c0_i32, %c0_i32_0, %c0_i32_1 : i32, i32, i32
  }
  func.func @transform_7(%arg0: i32) -> (i32, i32, i32) {
    %c0_i32 = arith.constant 0 : i32
    %c0_i32_0 = arith.constant 0 : i32
    %c0_i32_1 = arith.constant 0 : i32
    %c0_i32_2 = arith.constant 0 : i32
    return %c0_i32, %c0_i32_0, %c0_i32_1 : i32, i32, i32
  }
  func.func @transform_8(%arg0: i32) -> (i32, i32) {
    %c0_i32 = arith.constant 0 : i32
    %c0_i32_0 = arith.constant 0 : i32
    %c0_i32_1 = arith.constant 0 : i32
    return %c0_i32, %c0_i32_0 : i32, i32
  }
  func.func @transform_9(%arg0: i32) -> (i32, i32) {
    %c0_i32 = arith.constant 0 : i32
    %c0_i32_0 = arith.constant 0 : i32
    %c0_i32_1 = arith.constant 0 : i32
    return %c0_i32, %c0_i32_0 : i32, i32
  }
  func.func @transform_10(%arg0: i32) -> (i32, i32) {
    %c0_i32 = arith.constant 0 : i32
    %c0_i32_0 = arith.constant 0 : i32
    %c0_i32_1 = arith.constant 0 : i32
    return %c0_i32, %c0_i32_0 : i32, i32
  }
  func.func @transform_11(%arg0: i32) -> (i32, i32) {
    %c1_i32 = arith.constant 1 : i32
    %0 = arith.subi %arg0, %c1_i32 : i32
    %c0_i32 = arith.constant 0 : i32
    %1 = arith.maxsi %0, %c0_i32 : i32
    %c0_i32_0 = arith.constant 0 : i32
    %c0_i32_1 = arith.constant 0 : i32
    return %c0_i32_0, %1 : i32, i32
  }
  func.func @transform_12(%arg0: i32) -> (i32, i32) {
    %c1_i32 = arith.constant 1 : i32
    %0 = arith.subi %arg0, %c1_i32 : i32
    %c0_i32 = arith.constant 0 : i32
    %1 = arith.maxsi %0, %c0_i32 : i32
    %c0_i32_0 = arith.constant 0 : i32
    %c0_i32_1 = arith.constant 0 : i32
    return %c0_i32_0, %1 : i32, i32
  }
  func.func @transform_13(%arg0: i32) -> (i32, i32) {
    %c1_i32 = arith.constant 1 : i32
    %0 = arith.subi %arg0, %c1_i32 : i32
    %c0_i32 = arith.constant 0 : i32
    %1 = arith.maxsi %0, %c0_i32 : i32
    %c0_i32_0 = arith.constant 0 : i32
    %c0_i32_1 = arith.constant 0 : i32
    return %c0_i32_0, %1 : i32, i32
  }
  func.func @transform_14(%arg0: i32) -> (i32, i32) {
    %c0_i32 = arith.constant 0 : i32
    %c0_i32_0 = arith.constant 0 : i32
    %c0_i32_1 = arith.constant 0 : i32
    return %c0_i32, %c0_i32_0 : i32, i32
  }
  func.func @transform_15(%arg0: i32) -> (i32, i32) {
    %c0_i32 = arith.constant 0 : i32
    %c0_i32_0 = arith.constant 0 : i32
    %c0_i32_1 = arith.constant 0 : i32
    return %c0_i32, %c0_i32_0 : i32, i32
  }
  func.func @transform_16(%arg0: i32) -> (i32, i32) {
    %c0_i32 = arith.constant 0 : i32
    %c0_i32_0 = arith.constant 0 : i32
    %c0_i32_1 = arith.constant 0 : i32
    return %c0_i32, %c0_i32_0 : i32, i32
  }
}

</mosaic_0001>

<bundles_post_ra>
// kernel: tpu_custom_call.1
= control target key start
LH: loop header
LB: loop body
LE: loop exit
PB: predicated region body
PF: predicated region fallthrough
CT: control target
= control target key end

     0   :  { %s3663_s0 = inlined_call_operand.hbm [shape: bf16[8,32], index: 0, kind: input, shape index: {}]   ;;  %s3664_s1 = inlined_call_operand.hbm [shape: f32[8,32], index: 1, kind: input, shape index: {}]   ;;  %s3665_s2 = inlined_call_operand.hbm [shape: f32[8,32], index: 2, kind: input, shape index: {}]   ;;  %s3666_s3 = inlined_call_operand.vmem [shape: s32[8,1], index: 3, kind: input, shape index: {}]   ;;  %s3667_s4 = inlined_call_operand.hbm [shape: bf16[8,8,32], index: 4, kind: input, shape index: {}]   ;;  %s3668_s5 = inlined_call_operand.hbm [shape: bf16[4,32,32], index: 5, kind: input, shape index: {}]   ;;  %s3669_s6 = inlined_call_operand.hbm [shape: bf16[4,32,32], index: 6, kind: input, shape index: {}]   ;;  %s3670_s7 = inlined_call_operand.hbm [shape: f32[4,1,32], index: 7, kind: input, shape index: {}]   ;;  %s3671_s8 = inlined_call_operand.vmem [shape: bf16[32,32], index: 8, kind: input, shape index: {}]   ;;  %s3672_s9 = inlined_call_operand.vmem [shape: bf16[32,32], index: 9, kind: input, shape index: {}]   ;;  %s3673_s10 = inlined_call_operand.vmem [shape: f32[1,32], index: 10, kind: input, shape index: {}]   ;;  %s3674_s11 = inlined_call_operand.vmem [shape: bf16[32,128], index: 11, kind: input, shape index: {}]   ;;  %s3675_s12 = inlined_call_operand.vmem [shape: f32[1,128], index: 12, kind: input, shape index: {}]   ;;  %s3676_s13 = inlined_call_operand.hbm [shape: f32[8,128], index: 13, kind: output, shape index: {0}]   ;;  %s3677_s14 = inlined_call_operand.vmem [shape: f32[8,1], index: 14, kind: output, shape index: {1}]   ;;  %s3678_s15 = inlined_call_operand.hbm [shape: f32[8,32], index: 15, kind: output, shape index: {2}]   ;;  %s3679_s16 = inlined_call_operand.hbm [shape: f32[8,32], index: 16, kind: output, shape index: {3}]  }
   0x1   :  { %3695 = sst [smem:[#allocation32_spill]] %s3663_s0 }
   0x2   :  { %3696 = sst [smem:[#allocation33_spill]] %s3664_s1 }
   0x3   :  { %3697 = sst [smem:[#allocation34_spill]] %s3665_s2 }
   0x4   :  { %3698 = sst [smem:[#allocation35_spill]] %s3666_s3 }
   0x5   :  { %3699 = sst [smem:[#allocation36_spill]] %s3668_s5 }
   0x6   :  { %3700 = sst [smem:[#allocation37_spill]] %s3669_s6 }
   0x7   :  { %3701 = sst [smem:[#allocation38_spill]] %s3670_s7 }
   0x8   :  { %3702 = sst [smem:[#allocation39_spill]] %s3671_s8 }
   0x9   :  { %3703 = sst [smem:[#allocation40_spill]] %s3672_s9 }
   0xa   :  { %3704 = sst [smem:[#allocation41_spill]] %s3673_s10 }
   0xb   :  { %3705 = sst [smem:[#allocation42_spill]] %s3674_s11 }
   0xc   :  { %3706 = sst [smem:[#allocation43_spill]] %s3675_s12 }
   0xd   :  { %3707 = sst [smem:[#allocation44_spill]] %s3676_s13 }
   0xe   :  { %3708 = sst [smem:[#allocation45_spill]] %s3677_s14 }
   0xf   :  { %3709 = sst [smem:[#allocation46_spill]] %s3678_s15 }
  0x10   :  { %3710 = sst [smem:[#allocation47_spill]] %s3679_s16 }
  0x11   :  { %22 = vsyncpa [#allocation10], 0 }
  0x12   :  { %23 = vsyncpa [#allocation13], 0 }
  0x13   :  { %24 = vsyncpa [#allocation16], 0 }
  0x14   :  { %26 = vsyncpa [#allocation16 + $0x1], 0 }
  0x15   :  { %27 = vsyncpa [#allocation19], 0 }
  0x16   :  { %28 = vsyncpa [#allocation11], 0 }
  0x17   :  { %30 = vsyncpa [#allocation11 + $0x1], 0 }
  0x18   :  { %31 = vsyncpa [#allocation23], 0  ;;  %s3015_s21 = smov 0   ;;  %s3017_s22 = smov 0  }
  0x19   :  { %s3019_s23 = smov 0   ;;  %s3021_s24 = smov 0  }
  0x1a   :  { %s3023_s25 = smov 0   ;;  %s3025_s26 = smov 0  }
  0x1b   :  { %s3027_s27 = smov 0  }
  0x1c LB: > { %s2905_s28 = smov [#allocation12]   ;;  %s3051_s30 = sadd.s32 4294967295, %s2903_s27   ;;  %s2903_s27 = sphi %s3027_s27, %s3769_s27   ;;  %s2899_s26 = sphi %s3025_s26, %s3768_s26   ;;  %s2895_s25 = sphi %s3023_s25, %s3767_s25   ;;  %s2891_s24 = sphi %s3021_s24, %s3766_s24   ;;  %s2887_s23 = sphi %s3019_s23, %s3765_s23   ;;  %s2883_s22 = sphi %s3017_s22, %s3764_s22   ;;  %s2879_s21 = sphi %s3015_s21, %s3763_s21  }
  0x1d   : > { %s465_s29 = sshll.u32 %s2905_s28, 4  ;;  %p2097_p0 = scmp.ge.s32.totalorder %s2903_s27, 1  ;;  %s3058_s29 = int_to_ptr.vmem [resolvable:$true] %s465_s29 }
  0x1e   : > { %p3687_p1 = scmp.eq.s32.totalorder %s3051_s30, 0  ;;  %p441_p3 = scmp.lt.s32.totalorder %s2903_s27, 3 }
  0x1f   : > { %s2906_s17 = smov [#allocation17]   ;;  %s2907_s20 = smov [#allocation18]  }
  0x20   : > { %p3061_p6 = pnand %p2097_p0, %p441_p3  ;;  %s489_s18 = sshll.u32 %s2906_s17, 4  ;;  %s3067_s18 = int_to_ptr.vmem [resolvable:$true] %s489_s18 }
  0x21   : > { %s502_s28 = sshll.u32 %s2907_s20, 4  ;;  %s2908_s16 = smov [#allocation9]   ;;  %s3075_s28 = int_to_ptr.vmem [resolvable:$true] %s502_s28 }
  0x22   : > { %s3711_s0 = scalar_select %p3061_p6, 1, 0 }
  0x23   : > { %p2362_p7 = pneg %p3061_p6  ;;  %s3077_s13 = sshll.u32 %s2908_s16, 4  ;;  %s455_s13 = int_to_ptr.vmem [resolvable:$true] %s3077_s13 }
  0x24   : > { %s3713_s1 = sld [smem:[#allocation33_spill]] }
  0x25   : > { %p3071_p8 = pnand %p2362_p7, %p3687_p1 }
  0x27   : > { %p3087_p10 = pneg %p3071_p8 }
  0x2a   : > { %s2543_s17 = scalar_lea.hbm %s3713_s1, 128 }
  0x2b   : > { %p2544_p9 = scmp.ne.s32.totalorder %s3713_s1, %s2543_s17  ;;  %p2550_p13 = scmp.lt.u32.totalorder %s2543_s17, %s3713_s1 }
  0x2d   : > { %p2546_p11 = pnand %p3087_p10, %p2544_p9 }
  0x2f   : > { %p2547_p12 = pneg %p2546_p11 }
  0x31   : > { %p2552_p0 = pnand %p2550_p13, %p2547_p12 }
  0x33   : > { %2555 = shalt.err (!%p2552_p0)
}
  0x34   : > { %s2556_s11 = scalar_lea.vmem %s3058_s29, 128  ;;  %p2564_p4 = scmp.lt.s32.totalorder %s3058_s29, %s3058_s29 }
  0x35   : > { %p2557_p3 = scmp.ne.s32.totalorder %s3058_s29, %s2556_s11  ;;  %p2565_p2 = scmp.lt.s32.totalorder %s2556_s11, %s2556_s11 }
  0x37   : > { %p2559_p7 = pnand %p2557_p3, %p3087_p10  ;;  %p2566_p9 = por %p2565_p2, %p2564_p4 }
  0x39   : > { %p2560_p5 = pneg %p2559_p7 }
  0x3b   : > { %p2567_p11 = pnand %p2566_p9, %p2560_p5 }
  0x3d   : > { %2570 = shalt.err (!%p2567_p11)
}
  0x3e   : > { %2368 = dma.hbm_to_vmem [thread:$0]  (!%p3071_p8), %s3713_s1, 128, %s3058_s29, [#allocation13]  }
  0x3f   : > { %s3715_s5 = sld [smem:[#allocation36_spill]] }
  0x45   : > { %s2571_s20 = scalar_lea.hbm %s3715_s5, 1024 }
  0x46   : > { %p2572_p12 = scmp.ne.s32.totalorder %s3715_s5, %s2571_s20  ;;  %p2578_p5 = scmp.lt.u32.totalorder %s2571_s20, %s3715_s5 }
  0x48   : > { %p2574_p2 = pnand %p2572_p12, %p3087_p10 }
  0x4a   : > { %p2575_p4 = pneg %p2574_p2 }
  0x4c   : > { %p2580_p13 = pnand %p2578_p5, %p2575_p4 }
  0x4e   : > { %2583 = shalt.err (!%p2580_p13)
}
  0x4f   : > { %s2584_s29 = scalar_lea.vmem %s3067_s18, 1024  ;;  %p2592_p9 = scmp.lt.s32.totalorder %s3067_s18, %s3067_s18 }
  0x50   : > { %p2585_p0 = scmp.ne.s32.totalorder %s3067_s18, %s2584_s29  ;;  %p2593_p11 = scmp.lt.s32.totalorder %s2584_s29, %s2584_s29 }
  0x52   : > { %p2587_p3 = pnand %p2585_p0, %p3087_p10  ;;  %p2594_p12 = por %p2593_p11, %p2592_p9 }
  0x54   : > { %p2588_p7 = pneg %p2587_p3 }
  0x56   : > { %p2595_p2 = pnand %p2594_p12, %p2588_p7 }
  0x58   : > { %2598 = shalt.err (!%p2595_p2)
}
  0x59   : > { %s3689_s8 = smov 64   ;;  %s3690_s9 = smov 4  }
  0x5a   : > { %2374 = dma.hbm_to_vmem [thread:$0]  (!%p3071_p8), %s3715_s5, 1024, %s3067_s18, [#allocation16], %s3689_s8, %s3689_s8, %s3690_s9  }
  0x5b   : > { %s3716_s6 = sld [smem:[#allocation37_spill]] }
  0x61   : > { %s2599_s20 = scalar_lea.hbm %s3716_s6, 1024 }
  0x62   : > { %p2600_p4 = scmp.ne.s32.totalorder %s3716_s6, %s2599_s20  ;;  %p2606_p0 = scmp.lt.u32.totalorder %s2599_s20, %s3716_s6 }
  0x64   : > { %p2602_p5 = pnand %p2600_p4, %p3087_p10 }
  0x66   : > { %p2603_p13 = pneg %p2602_p5 }
  0x68   : > { %p2608_p3 = pnand %p2606_p0, %p2603_p13 }
  0x6a   : > { %2611 = shalt.err (!%p2608_p3)
}
  0x6b   : > { %s2612_s18 = scalar_lea.vmem %s3075_s28, 1024  ;;  %p2620_p12 = scmp.lt.s32.totalorder %s3075_s28, %s3075_s28 }
  0x6c   : > { %p2613_p7 = scmp.ne.s32.totalorder %s3075_s28, %s2612_s18  ;;  %p2621_p2 = scmp.lt.s32.totalorder %s2612_s18, %s2612_s18 }
  0x6e   : > { %p2615_p9 = pnand %p2613_p7, %p3087_p10  ;;  %p2622_p4 = por %p2621_p2, %p2620_p12 }
  0x70   : > { %p2616_p11 = pneg %p2615_p9 }
  0x72   : > { %p2623_p5 = pnand %p2622_p4, %p2616_p11 }
  0x74   : > { %2626 = shalt.err (!%p2623_p5)
}
  0x75   : > { %2377 = dma.hbm_to_vmem [thread:$0]  (!%p3071_p8), %s3716_s6, 1024, %s3075_s28, [#allocation19], %s3689_s8, %s3689_s8, %s3690_s9  }
  0x76   : > { %s3717_s17 = sld [smem:[#allocation32_spill]] }
  0x7c   : > { %s2627_s20 = scalar_lea.hbm %s3717_s17, 64 }
  0x7d   : > { %p2628_p13 = scmp.ne.s32.totalorder %s3717_s17, %s2627_s20  ;;  %p2634_p7 = scmp.lt.u32.totalorder %s2627_s20, %s3717_s17 }
  0x7f   : > { %p2630_p0 = pnand %p2628_p13, %p3087_p10 }
  0x81   : > { %p2631_p3 = pneg %p2630_p0 }
  0x83   : > { %p2636_p9 = pnand %p2634_p7, %p2631_p3 }
  0x85   : > { %2639 = shalt.err (!%p2636_p9)
}
  0x86   : > { %s2640_s1 = scalar_lea.vmem %s455_s13, 64  ;;  %p2648_p4 = scmp.lt.s32.totalorder %s455_s13, %s455_s13 }
  0x87   : > { %p2641_p11 = scmp.ne.s32.totalorder %s455_s13, %s2640_s1  ;;  %p2649_p5 = scmp.lt.s32.totalorder %s2640_s1, %s2640_s1 }
  0x89   : > { %p2643_p12 = pnand %p2641_p11, %p3087_p10  ;;  %p2650_p1 = por %p2649_p5, %p2648_p4 }
  0x8b   : > { %p2644_p2 = pneg %p2643_p12 }
  0x8d   : > { %p2651_p6 = pnand %p2650_p1, %p2644_p2 }
  0x8f   : > { %2654 = shalt.err (!%p2651_p6)
}
  0x90   : > { %2365 = dma.hbm_to_vmem [thread:$0]  (!%p3071_p8), %s3717_s17, 64, %s455_s13, [#allocation10]  }
  0x91   : > { %s2911_s14 = smov [#allocation14]   ;;  %s2912_s20 = smov [#allocation20]  }
  0x92   : > { %s476_s15 = sshll.u32 %s2911_s14, 4  ;;  %s515_s16 = sshll.u32 %s2912_s20, 4  ;;  %s477_s15 = int_to_ptr.vmem [resolvable:$true] %s476_s15  ;;  %s516_s16 = int_to_ptr.vmem [resolvable:$true] %s515_s16 }
  0x93   : > { %s3718_s2 = sld [smem:[#allocation34_spill]] }
  0x99   : > { %s2655_s18 = scalar_lea.hbm %s3718_s2, 128 }
  0x9a   : > { %p2656_p1 = scmp.ne.s32.totalorder %s3718_s2, %s2655_s18  ;;  %p2662_p0 = scmp.lt.u32.totalorder %s2655_s18, %s3718_s2 }
  0x9c   : > { %p2658_p6 = pnand %p2656_p1, %p3087_p10 }
  0x9e   : > { %p2659_p13 = pneg %p2658_p6 }
  0xa0   : > { %p2664_p3 = pnand %p2662_p0, %p2659_p13 }
  0xa2   : > { %2667 = shalt.err (!%p2664_p3)
}
  0xa3   : > { %s2668_s13 = scalar_lea.vmem %s477_s15, 128  ;;  %p2676_p12 = scmp.lt.s32.totalorder %s477_s15, %s477_s15 }
  0xa4   : > { %p2669_p7 = scmp.ne.s32.totalorder %s477_s15, %s2668_s13  ;;  %p2677_p2 = scmp.lt.s32.totalorder %s2668_s13, %s2668_s13 }
  0xa6   : > { %p2671_p9 = pnand %p2669_p7, %p3087_p10  ;;  %p2678_p4 = por %p2677_p2, %p2676_p12 }
  0xa8   : > { %p2672_p11 = pneg %p2671_p9 }
  0xaa   : > { %p2679_p5 = pnand %p2678_p4, %p2672_p11 }
  0xac   : > { %2682 = shalt.err (!%p2679_p5)
}
  0xad   : > { %2371 = dma.hbm_to_vmem [thread:$0]  (!%p3071_p8), %s3718_s2, 128, %s477_s15, [#allocation13]  }
  0xae   : > { %s3719_s7 = sld [smem:[#allocation38_spill]] }
  0xb4   : > { %s2683_s20 = scalar_lea.hbm %s3719_s7, 64 }
  0xb5   : > { %p2684_p1 = scmp.ne.s32.totalorder %s3719_s7, %s2683_s20  ;;  %p2690_p0 = scmp.lt.u32.totalorder %s2683_s20, %s3719_s7 }
  0xb7   : > { %p2686_p6 = pnand %p2684_p1, %p3087_p10 }
  0xb9   : > { %p2687_p13 = pneg %p2686_p6 }
  0xbb   : > { %p2692_p3 = pnand %p2690_p0, %p2687_p13 }
  0xbd   : > { %2695 = shalt.err (!%p2692_p3)
}
  0xbe   : > { %s2696_s28 = scalar_lea.vmem %s516_s16, 64  ;;  %p2704_p12 = scmp.lt.s32.totalorder %s516_s16, %s516_s16 }
  0xbf   : > { %p2697_p7 = scmp.ne.s32.totalorder %s516_s16, %s2696_s28  ;;  %p2705_p2 = scmp.lt.s32.totalorder %s2696_s28, %s2696_s28 }
  0xc1   : > { %p2699_p9 = pnand %p2697_p7, %p3087_p10  ;;  %p2706_p4 = por %p2705_p2, %p2704_p12 }
  0xc3   : > { %p2700_p11 = pneg %p2699_p9 }
  0xc5   : > { %p2707_p5 = pnand %p2706_p4, %p2700_p11 }
  0xc7   : > { %2710 = shalt.err (!%p2707_p5)
}
  0xc8   : > { %s2913_s15 = smov 16   ;;  %s2914_s10 = smov 1  }
  0xc9   : > { %2380 = dma.hbm_to_vmem [thread:$0]  (!%p3071_p8), %s3719_s7, 64, %s516_s16, [#allocation19], %s2913_s15, %s2913_s15, %s2914_s10  }
  0xca   : > { %s2090_s12 = sadd.s32 4294967294, %s2903_s27   ;;  %s3217_s9 = sadd.s32 1, %s2903_s27  }
  0xcb   : > { %p125_p10 = scmp.lt.s32.totalorder %s2903_s27, 0  ;;  %p127_p1 = scmp.lt.s32.totalorder %s3217_s9, 0 }
  0xcc   : > { %s132_s14 = sadd.s32 1, %s2899_s26  ;;  %p139_p8 = scmp.ne.s32.totalorder %s2899_s26, %s2895_s25 }
  0xcd   : > { %s3223_s19 = scalar_select %p125_p10, %s2903_s27, 0 }
  0xce   : > { %s128_s16 = scalar_select %p127_p1, %s3217_s9, 0 }
  0xcf   : > { %p140_p6 = scmp.eq.s32.totalorder %s2903_s27, 0  ;;  %p145_p13 = scmp.ne.s32.totalorder %s2895_s25, %s2891_s24 }
  0xd0   : > { %s129_s20 = ssub.s32 %s3223_s19, %s128_s16  ;;  %p3721_p7 = scmp.eq.s32.totalorder %s3051_s30, 0 }
  0xd1   : > { %p130_p0 = scmp.eq.s32.totalorder %s129_s20, 0  ;;  %p3232_p3 = por %p140_p6, %p139_p8 }
  0xd2   : > { %p3238_p9 = por %p3721_p7, %p145_p13  ;;  %p346_p11 = scmp.gt.s32.totalorder %s3051_s30, 0 }
  0xd3   : > { %s3244_s18 = scalar_select %p130_p0, %s2899_s26, %s132_s14  }
  0xd4   : > { %s347_s1 = scalar_select %p346_p11, %s3051_s30, 0 }
  0xd5   : > { %s2096_s28 = sadd.s32 4294967295, %s3217_s9  ;;  %s354_s24 = sadd.s32 1, %s2887_s23 }
  0xd6   : > { %p349_p12 = scmp.gt.s32.totalorder %s2096_s28, 0  ;;  %p364_p2 = scmp.ne.s32.totalorder %s2887_s23, %s2883_s22 }
  0xd7   : > { %p370_p4 = scmp.ne.s32.totalorder %s2883_s22, %s2879_s21  ;;  %p371_p5 = scmp.eq.s32.totalorder %s2090_s12, 1 }
  0xd8   : > { %s3771_s28 = smov (!%p349_p12, %s2096_s28), 0  ;;  %p3723_p10 = scmp.eq.s32.totalorder %s3051_s30, 1 }
  0xd9   : > { %p3259_p8 = por %p371_p5, %p370_p4  ;;  %s351_s13 = ssub.s32 %s347_s1, %s3771_s28 }
  0xda   : > { %p3255_p1 = por %p3723_p10, %p364_p2  ;;  %p2395_p6 = scmp.lt.s32.totalorder %s2903_s27, 2 }
  0xdb   : > { %s3725_s10 = scalar_select %p3259_p8, 1, 0 }
  0xdc   : > { %s3724_s15 = scalar_select %p3255_p1, 1, 0 }
  0xdd   : > { %p352_p13 = scmp.eq.s32.totalorder %s351_s13, 0  ;;  %s538_s8 = sand.u32 1, %s2903_s27  }
  0xde   : > { %s540_s14 = sand.u32 1, %s2899_s26   ;;  %s2106_s2 = sshll.u32 %s3223_s19, 6 }
  0xdf   : > { %s3267_s16 = scalar_select %p352_p13, %s2887_s23, %s354_s24  }
  0xe0   : > { %s2105_s20 = sshll.u32 %s540_s14, 5  ;;  %s3273_s6 = scalar_lea.hbm %s3667_s4, %s2106_s2 }
  0xe1   : > { %s542_s7 = scalar_lea.vmem [#allocation15], %s2105_s20  ;;  %p3277_p0 = pnand %p2395_p6, %p3232_p3 }
  0xe2   : > { %s550_s17 = sshll.u32 %s542_s7, 4  ;;  %s3283_s19 = scalar_lea.sflag [#allocation16], %s538_s8  ;;  %s3281_s17 = int_to_ptr.vmem [resolvable:$true] %s550_s17 }
  0xe3   : > { %s2711_s5 = scalar_lea.hbm %s3273_s6, 512  ;;  %p2713_p11 = pneg %p3277_p0 }
  0xe4   : > { %p2712_p7 = scmp.ne.s32.totalorder %s3273_s6, %s2711_s5  ;;  %s2716_s11 = scalar_lea.hbm %s3667_s4, 512 }
  0xe5   : > { %p2717_p3 = scmp.lt.u32.totalorder %s3273_s6, %s3667_s4  ;;  %p2718_p4 = scmp.lt.u32.totalorder %s2716_s11, %s2711_s5 }
  0xe6   : > { %p2714_p12 = pnand %p2713_p11, %p2712_p7  ;;  %p2720_p10 = scmp.lt.u32.totalorder %s2711_s5, %s3273_s6 }
  0xe7   : > { %p2719_p5 = por %p2718_p4, %p2717_p3 }
  0xe8   : > { %p2715_p2 = pneg %p2714_p12 }
  0xe9   : > { %p2721_p6 = por %p2720_p10, %p2719_p5 }
  0xeb   : > { %p2722_p13 = pnand %p2721_p6, %p2715_p2 }
  0xed   : > { %2725 = shalt.err (!%p2722_p13)
}
  0xee   : > { %s2726_s13 = scalar_lea.vmem %s3281_s17, 512  ;;  %s2915_s8 = smov [#allocation15]  }
  0xef   : > { %p2727_p7 = scmp.ne.s32.totalorder %s3281_s17, %s2726_s13  ;;  %s2731_s14 = sshll.u32 %s2915_s8, 4  ;;  %s2732_s14 = int_to_ptr.vmem [resolvable:$false] %s2731_s14 }
  0xf0   : > { %s2733_s20 = scalar_lea.vmem %s2732_s14, 1024  ;;  %p2734_p1 = scmp.lt.s32.totalorder %s3281_s17, %s2732_s14 }
  0xf1   : > { %p2729_p12 = pnand %p2727_p7, %p2713_p11  ;;  %p2735_p3 = scmp.lt.s32.totalorder %s2733_s20, %s2726_s13 }
  0xf3   : > { %p2730_p8 = pneg %p2729_p12  ;;  %p2736_p4 = por %p2735_p3, %p2734_p1 }
  0xf5   : > { %p2737_p5 = pnand %p2736_p4, %p2730_p8 }
  0xf7   : > { %2740 = shalt.err (!%p2737_p5)
}
  0xf8   : > { %s3727_s12 = smov 4   ;;  %s3728_s5 = smov 64  }
  0xf9   : > { %2384 = dma.hbm_to_vmem [thread:$0]  (!%p3277_p0), %s3273_s6, 512, %s3281_s17, %s3283_s19, %s3728_s5, %s3728_s5, %s3727_s12  }
  0xfa   : > { %p3729_p11 = scmp.ne.s32.totalorder %s3711_s0, 0 }
  0xfb   : > { %p3730_p2 = scmp.eq.s32.totalorder (!%p3729_p11), %s3051_s30, 0 }
  0xfc   : > { %587 = sbr.rel (%p3729_p11) target bundleno = 2353 (0x931), region = 72 }
 0x103   : > { %2850 = dma.done.wait (%p3730_p2), [#allocation10], 64   ;;  %p3731_p10 = pmov %p3730_p2 }
 0x104   : > { %p3732_p1 = pmov %p3730_p2 }
 0x105   : > { %2852 = vsyncadd (%p3731_p10), [#allocation10], 4294967232 }
 0x106   : > { %2854 = dma.done.wait (%p3732_p1), [#allocation13], 256   ;;  %p3733_p8 = pmov %p3732_p1 }
 0x107   : > { %s601_s1 = sand.u32 1, %s3051_s30   ;;  %s603_s6 = sand.u32 1, %s2895_s25  }
 0x108   : > { %2856 = vsyncadd (%p3733_p8), [#allocation13], 4294967040  ;;  %s2111_s17 = sshll.u32 %s603_s6, 5  ;;  %s602_s0 = scalar_lea.sflag [#allocation16], %s601_s1 }
 0x109   : > { %s3326_s19 = scalar_lea.vmem [#allocation15], %s2111_s17 }
 0x10a   : > { %2858 = dma.done.wait (%p3238_p9), %s602_s0, 512  }
 0x10b   : > { %2860 = vsyncadd (%p3238_p9), %s602_s0, 4294966784  ;;  %p3734_p0 = pmov %p3732_p1 }
 0x10d   : > { %2862 = dma.done.wait (%p3734_p0), [#allocation16], 1024   ;;  %p3735_p6 = pmov %p3734_p0 }
 0x10e   : > { %p3736_p13 = pmov %p3734_p0 }
 0x10f   : > { %2864 = vsyncadd (%p3735_p6), [#allocation16], 4294966272 }
 0x110   : > { %2866 = dma.done.wait (%p3736_p13), [#allocation19], 1088   ;;  %p3737_p7 = pmov %p3734_p0 }
 0x111   : > { %s3693_s2 = sand.u32 1, %s2883_s22   ;;  %p3738_p9 = scmp.ne.s32.totalorder %s3051_s30, 0 }
 0x112   : > { %2868 = vsyncadd (%p3737_p7), [#allocation19], 4294966208  ;;  %s3343_s7 = sshll.u32 %s3693_s2, 3  ;;  %vm1235_vm0 = vcmask (!%p3738_p9), 7168   ;;  %v2486_v0 = vld [vmem:[#allocation18] sm:$0xff] (!%p3738_p9)   ;;  %v2916_v1 = vmov (!%p3738_p9), 0.0  }
 0x113   : > { %s3694_s29 = scalar_lea.vmem [#allocation21], %s3343_s7  ;;  %707 = sbr.rel (%p3738_p9) target bundleno = 554 (0x22a), region = 104  ;;  %2238 = vmatprep.subr.bf16.mxu0 (!%p3738_p9), %v2916_v1  ;;  %v2917_v2 = vmov (!%p3738_p9), -inf   ;;  %1237 = vst.msk [vmem:[#allocation3] sm:$0xff] (!%p3738_p9), %vm1235_vm0, %v2916_v1  ;;  %1240 = vst.msk [vmem:[#allocation8] sm:$0xff] (!%p3738_p9), %vm1235_vm0, %v2916_v1  ;;  %2246 = vmatprep.subr.bf16.mxu1 (!%p3738_p9), %v2916_v1  ;;  %v2487_v3 = vld [vmem:[#allocation17] sm:$0xff] (!%p3738_p9)  }
 0x114   : > { %1236 = vst.msk [vmem:[#allocation2] sm:$0xff] (!%p3738_p9), %vm1235_vm0, %v2917_v2  ;;  %1239 = vst.msk [vmem:[#allocation7] sm:$0xff] (!%p3738_p9), %vm1235_vm0, %v2917_v2  ;;  %2239 = vmatpush3.bf16.msra.mxu0 (!%p3738_p9), %v2486_v0  ;;  %v2488_v4 = vld [vmem:[#allocation18 + $0x8] sm:$0xff] (!%p3738_p9)   ;;  %vm2918_vm1 = vmmov (!%p3738_p9), 0   ;;  %vm732_vm2 = vcmask (!%p3738_p9), 261120   ;;  %2247 = vmatpush3.bf16.msra.mxu1 (!%p3738_p9), %v2487_v3  ;;  %v709_v6 = vld [vmem:[#allocation12] sm:$0xff] (!%p3738_p9) }
 0x115   : > { %2240 = vmatprep.subr.bf16.mxu0 (!%p3738_p9), %v2916_v1  ;;  %2242 = vmatprep.mubr.msk.bf16.mxu0 (!%p3738_p9), %vm2918_vm1, %v2916_v1  ;;  %v2489_v5 = vld [vmem:[#allocation17 + $0x8] sm:$0xff] (!%p3738_p9)   ;;  %1238 = vst.msk [vmem:[#allocation4] sm:$0xff] (!%p3738_p9), %vm732_vm2, %v2916_v1  ;;  %v711_v7 = vpack.c.bf16 (!%p3738_p9), %v709_v6, %v709_v6  ;;  %v2490_v8 = vld [vmem:[#allocation18 + $0x10] sm:$0xff] (!%p3738_p9)   ;;  %v2492_v11 = vld [vmem:[#allocation18 + $0x18] sm:$0xff] (!%p3738_p9)  }
 0x116   : > { %2250 = vmatprep.mubr.msk.bf16.mxu1 (!%p3738_p9), %vm2918_vm1, %v2916_v1  ;;  %2248 = vmatprep.subr.bf16.mxu1 (!%p3738_p9), %v2916_v1  ;;  %v708_v9 = vld [vmem:[#allocation9] sm:$0xf] (!%p3738_p9)  ;;  %v2491_v10 = vld [vmem:[#allocation17 + $0x10] sm:$0xff] (!%p3738_p9)   ;;  %v2493_v12 = vld [vmem:[#allocation17 + $0x18] sm:$0xff] (!%p3738_p9)  }
 0x117   : > { %v2494_v13 = vld [vmem:[#allocation18 + $0x20] sm:$0xff] (!%p3738_p9)   ;;  %v2496_v15 = vld [vmem:[#allocation18 + $0x28] sm:$0xff] (!%p3738_p9)   ;;  %v2498_v17 = vld [vmem:[#allocation18 + $0x30] sm:$0xff] (!%p3738_p9)  }
 0x118   : > { %2241 = vmatpush3.bf16.msra.mxu0 (!%p3738_p9), %v2488_v4  ;;  %2249 = vmatpush3.bf16.msra.mxu1 (!%p3738_p9), %v2489_v5  ;;  %v2495_v14 = vld [vmem:[#allocation17 + $0x20] sm:$0xff] (!%p3738_p9)   ;;  %v2497_v16 = vld [vmem:[#allocation17 + $0x28] sm:$0xff] (!%p3738_p9)   ;;  %v2499_v18 = vld [vmem:[#allocation17 + $0x30] sm:$0xff] (!%p3738_p9)  }
 0x119   : > { %2254 = vmatprep.subr.bf16.mxu0 (!%p3738_p9), %v2916_v1  ;;  %2262 = vmatprep.subr.bf16.mxu1 (!%p3738_p9), %v2916_v1  ;;  %v2500_v19 = vld [vmem:[#allocation18 + $0x38] sm:$0xff] (!%p3738_p9)   ;;  %v2136_v24 = vld [vmem:[#allocation20] ss:$0 sm:$0xff] (!%p3738_p9)  ;;  %v2144_v36 = vld [vmem:[#allocation20 + $0x1] ss:$0 sm:$0xff] (!%p3738_p9) }
 0x11a   : > { %v2501_v20 = vld [vmem:[#allocation17 + $0x38] sm:$0xff]   ;;  %v2152_v48 = vld [vmem:[#allocation20 + $0x2] ss:$0 sm:$0xff]  ;;  %v2159_v61 = vld [vmem:[#allocation20 + $0x3] ss:$0 sm:$0xff] }
 0x11b   : > { %2243 = vmatmul.mubr.msk.bf16.vlgmr.msra.gmra.mrb[0].mxu0 %vm732_vm2, %v711_v7  ;;  %2251 = vmatmul.mubr.msk.bf16.vlgmr.msra.gmra.mrb[0].mxu1 %vm732_vm2, %v708_v9 }
 0x11c   : > { %2255 = vmatpush3.bf16.msra.mxu0 %v2490_v8  ;;  %2258 = vmatprep.mubr.msk.bf16.mxu0 %vm2918_vm1, %v2916_v1 }
 0x11d   : > { %2256 = vmatprep.subr.bf16.mxu0 %v2916_v1  ;;  %2263 = vmatpush3.bf16.msra.mxu1 %v2491_v10 }
 0x11e   : > { %2266 = vmatprep.mubr.msk.bf16.mxu1 %vm2918_vm1, %v2916_v1  ;;  %2264 = vmatprep.subr.bf16.mxu1 %v2916_v1 }
 0x120   : > { %2257 = vmatpush3.bf16.msra.mxu0 %v2492_v11  ;;  %v710_v11 = vld [vmem:[#allocation14] sm:$0xff] }
 0x121   : > { %2270 = vmatprep.subr.bf16.mxu0 %v2916_v1  ;;  %2265 = vmatpush3.bf16.msra.mxu1 %v2493_v12 }
 0x122   : > { %2278 = vmatprep.subr.bf16.mxu1 %v2916_v1 }
 0x123   : > { %2259 = vmatmul.mubr.msk.bf16.vlgmr.msra.gmra.mrb[4].mxu0 %vm732_vm2, %v711_v7 }
 0x124   : > { %2271 = vmatpush3.bf16.msra.mxu0 %v2494_v13  ;;  %2274 = vmatprep.mubr.msk.bf16.mxu0 %vm2918_vm1, %v2916_v1 }
 0x125   : > { %2267 = vmatmul.mubr.msk.bf16.vlgmr.msra.gmra.mrb[4].mxu1 %vm732_vm2, %v708_v9  ;;  %2272 = vmatprep.subr.bf16.mxu0 %v2916_v1 }
 0x126   : > { %2279 = vmatpush3.bf16.msra.mxu1 %v2495_v14  ;;  %2282 = vmatprep.mubr.msk.bf16.mxu1 %vm2918_vm1, %v2916_v1 }
 0x127   : > { %2280 = vmatprep.subr.bf16.mxu1 %v2916_v1 }
 0x128   : > { %2273 = vmatpush3.bf16.msra.mxu0 %v2496_v15 }
 0x129   : > { %2286 = vmatprep.subr.bf16.mxu0 %v2916_v1 }
 0x12a   : > { %2281 = vmatpush3.bf16.msra.mxu1 %v2497_v16 }
 0x12b   : > { %2275 = vmatmul.mubr.msk.bf16.vlgmr.msra.gmra.mrb[8].mxu0 %vm732_vm2, %v711_v7  ;;  %2294 = vmatprep.subr.bf16.mxu1 %v2916_v1 }
 0x12c   : > { %2287 = vmatpush3.bf16.msra.mxu0 %v2498_v17  ;;  %2290 = vmatprep.mubr.msk.bf16.mxu0 %vm2918_vm1, %v2916_v1 }
 0x12d   : > { %2283 = vmatmul.mubr.msk.bf16.vlgmr.msra.gmra.mrb[8].mxu1 %vm732_vm2, %v708_v9  ;;  %2288 = vmatprep.subr.bf16.mxu0 %v2916_v1 }
 0x12e   : > { %2295 = vmatpush3.bf16.msra.mxu1 %v2499_v18  ;;  %2298 = vmatprep.mubr.msk.bf16.mxu1 %vm2918_vm1, %v2916_v1 }
 0x12f   : > { %2296 = vmatprep.subr.bf16.mxu1 %v2916_v1 }
 0x130   : > { %2289 = vmatpush3.bf16.msra.mxu0 %v2500_v19 }
 0x132   : > { %2297 = vmatpush3.bf16.msra.mxu1 %v2501_v20 }
 0x133   : > { %2291 = vmatmul.mubr.msk.bf16.vlgmr.msra.gmra.mrb[12].mxu0 %vm732_vm2, %v711_v7 }
 0x135   : > { %2299 = vmatmul.mubr.msk.bf16.vlgmr.msra.gmra.mrb[12].mxu1 %vm732_vm2, %v708_v9 }
 0x1ee   : > { %v770_v21 = vpop.f32.mrb[0].mxu0  ;;  %v825_v23 = vpop.f32.mrb[0].mxu1 }
 0x1ef   : > { %v2244_v22 = vpop.f32.mrb[1].mxu0  ;;  %v826_v26 = vadd.f32 %v825_v23, %v770_v21  ;;  %v2252_v27 = vpop.f32.mrb[1].mxu1 }
 0x1f0   : > { %v773_v25 = vpop.f32.mrb[2].mxu0  ;;  %v828_v29 = vpop.f32.mrb[2].mxu1 }
 0x1f1   : > { %v2245_v28 = vpop.f32.mrb[3].mxu0  ;;  %v838_v30 = vadd.f32 %v2136_v24, %v826_v26  ;;  %v2253_v31 = vpop.f32.mrb[3].mxu1 }
 0x1f3   : > { %v2137_v32 = vmul.f32 -1.442695, %v838_v30 }
 0x1f5   : > { %2502 = vpow2.f32 %v2137_v32 }
 0x1f6   : > { %v901_v33 = vpop.f32.mrb[4].mxu0 }
 0x1f7   : > { %v2260_v34 = vpop.f32.mrb[5].mxu0 }
 0x1f8   : > { %v953_v35 = vpop.f32.mrb[4].mxu1  ;;  %v904_v37 = vpop.f32.mrb[6].mxu0 }
 0x1f9   : > { %v954_v38 = vadd.f32 %v953_v35, %v901_v33  ;;  %v2268_v39 = vpop.f32.mrb[5].mxu1  ;;  %v2261_v40 = vpop.f32.mrb[7].mxu0 }
 0x1fa   : > { %v956_v41 = vpop.f32.mrb[6].mxu1 }
 0x1fb   : > { %v967_v42 = vadd.f32 %v2144_v36, %v954_v38  ;;  %v2269_v43 = vpop.f32.mrb[7].mxu1 }
 0x1fd   : > { %v2145_v44 = vmul.f32 -1.442695, %v967_v42 }
 0x1fe   : > { %v1030_v45 = vpop.f32.mrb[8].mxu0 }
 0x1ff   : > { %2504 = vpow2.f32 %v2145_v44  ;;  %v2276_v46 = vpop.f32.mrb[9].mxu0  ;;  %v2503_v50 = vpop.eup %2502 }
 0x200   : > { %v1082_v47 = vpop.f32.mrb[8].mxu1  ;;  %v1033_v49 = vpop.f32.mrb[10].mxu0  ;;  %v842_v54 = vadd.f32 1.0, %v2503_v50 }
 0x201   : > { %v1083_v51 = vadd.f32 %v1082_v47, %v1030_v45  ;;  %v2284_v52 = vpop.f32.mrb[9].mxu1  ;;  %v2277_v53 = vpop.f32.mrb[11].mxu0 }
 0x202   : > { %v1085_v55 = vpop.f32.mrb[10].mxu1  ;;  %2506 = vrcp.f32 %v842_v54 }
 0x203   : > { %v1096_v56 = vadd.f32 %v2152_v48, %v1083_v51  ;;  %v2285_v57 = vpop.f32.mrb[11].mxu1 }
 0x205   : > { %2508 = vtanh.f32 %v1096_v56 }
 0x206   : > { %v1154_v58 = vpop.f32.mrb[12].mxu0 }
 0x207   : > { %v2292_v59 = vpop.f32.mrb[13].mxu0 }
 0x208   : > { %v1206_v60 = vpop.f32.mrb[12].mxu1  ;;  %v1157_v62 = vpop.f32.mrb[14].mxu0 }
 0x209   : > { %v2505_v63 = vpop.eup %2504  ;;  %v1207_v0 = vadd.f32 %v1206_v60, %v1154_v58  ;;  %v2300_v1 = vpop.f32.mrb[13].mxu1 }
 0x20a   : > { %v2293_v2 = vpop.f32.mrb[15].mxu0  ;;  %v971_v3 = vadd.f32 1.0, %v2505_v63  ;;  %v1209_v4 = vpop.f32.mrb[14].mxu1 }
 0x20b   : > { %v1220_v5 = vadd.f32 %v2159_v61, %v1207_v0  ;;  %v2301_v6 = vpop.f32.mrb[15].mxu1 }
 0x20c   : > { %2510 = vrcp.f32 %v971_v3  ;;  %v2507_v8 = vpop.eup %2506 }
 0x20d   : > { %v2160_v7 = vmul.f32 -1.442695, %v1220_v5 }
 0x20f   : > { %v2509_v9 = vpop.eup %2508  ;;  %2512 = vpow2.f32 %v2160_v7 }
 0x210   : > { %v1228_v10 = vmul.f32 %v2509_v9, %v2507_v8 }
 0x216   : > { %v2511_v12 = vpop.eup %2510 }
 0x217   : > { %v1227_v13 = vmul.f32 %v2511_v12, %v710_v11 }
 0x219   : > { %v2513_v14 = vpop.eup %2512  ;;  %v1229_v15 = vadd.f32 %v1228_v10, %v1227_v13 }
 0x21a   : > { %v1224_v16 = vadd.f32 1.0, %v2513_v14 }
 0x21b   : > { %2514 = vtanh.f32 %v1229_v15  ;;  %1234 = vst.msk [vmem:[#allocation24] sm:$0xff] %vm732_vm2, %v1229_v15 }
 0x21c   : > { %2516 = vrcp.f32 %v1224_v16 }
 0x225   : > { %v2515_v17 = vpop.eup %2514 }
 0x226   : > { %v2517_v18 = vpop.eup %2516 }
 0x227   : > { %v1231_v19 = vmul.f32 %v2517_v18, %v2515_v17 }
 0x229   : > { %1232 = vst.msk [vmem:[#allocation6] sm:$0xff] %vm732_vm2, %v1231_v19  ;;  %1233 = vst.msk [vmem:[#allocation22] sm:$0xff] %vm732_vm2, %v1231_v19 }
 0x22a PF: > { %p2161_p12 = scmp.ge.s32.totalorder %s3051_s30, 1 }
 0x22b   : > { %v1267_v20 = vlaneseq (!%p2161_p12)  ;;  %v2919_v21 = vmov (!%p2161_p12), 1966171168   ;;  %v3400_v27 = vld [vmem:[%s3326_s19] sm:$0xff] (!%p2161_p12)   ;;  %v3404_v29 = vld [vmem:[%s3326_s19 + $0x10] sm:$0xff] (!%p2161_p12)   ;;  %v2920_v30 = vmov (!%p2161_p12), 0   ;;  %v3410_v33 = vld [vmem:[%s3326_s19 + $0x8] sm:$0xff] (!%p2161_p12)  }
 0x22c   : > { %1244 = sbr.rel (%p2161_p12) target bundleno = 1201 (0x4b1), region = 108  ;;  %v1265_v22 = vunpack.c.l.s4 (!%p2161_p12), %v2919_v21  ;;  %2518 = vset.pattern.permute.xlu0 (!%p2161_p12), %v2920_v30  ;;  %2519 = vset.pattern.permute.xlu1 (!%p2161_p12), %v2920_v30  ;;  %v2188_v35 = vunpack.c.l.bf16 (!%p2161_p12), %v3400_v27  ;;  %v2196_v36 = vunpack.c.l.bf16 (!%p2161_p12), %v3404_v29  ;;  %v2192_v41 = vunpack.c.l.bf16 (!%p2161_p12), %v3410_v33  ;;  %v3426_v54 = vld [vmem:[%s3326_s19 + $0x18] sm:$0xff] (!%p2161_p12)   ;;  %s3739_s3 = sld [smem:[#allocation35_spill]] (!%p2161_p12) }
 0x22d   : > { %v3397_v24 = vshrl.u32 (!%p2161_p12), %v1267_v20, 7  ;;  %v2197_v42 = vunpack.c.h.bf16 (!%p2161_p12), %v3404_v29  ;;  %vm1360_vm3 = vcmask (!%p2161_p12), 261120   ;;  %v2189_v47 = vunpack.c.h.bf16 (!%p2161_p12), %v3400_v27  ;;  %s2162_s24 = sshll.u32 (!%p2161_p12), %s3051_s30, 3 }
 0x22e   : > { %v1266_v25 = vunpack.c.0.s8 (!%p2161_p12), %v1265_v22  ;;  %v2193_v56 = vunpack.c.h.bf16 (!%p2161_p12), %v3410_v33  ;;  %v2200_v63 = vunpack.c.l.bf16 (!%p2161_p12), %v3426_v54  ;;  %v2201_v6 = vunpack.c.h.bf16 (!%p2161_p12), %v3426_v54 }
 0x22f   : > { %v3407_v32 = vsub.s32 (!%p2161_p12), 0, %v3397_v24  ;;  %v1387_v16 = vand.u32 (!%p2161_p12), 127, %v1267_v20  ;;  %vm1435_vm4 = vcmask (!%p2161_p12), 1041409   ;;  %vm1437_vm5 = vcmask (!%p2161_p12), 1042434  }
 0x230   : > { %v1245_v23 = vld [vmem:[#allocation6] sm:$0xff] (!%p2161_p12)  ;;  %v1269_v28 = vsub.s32 (!%p2161_p12), %v1266_v25, %v3397_v24  ;;  %vm1439_vm6 = vcmask (!%p2161_p12), 1043459   ;;  %vm1441_vm7 = vcmask (!%p2161_p12), 1044484   ;;  %vm1443_vm8 = vcmask (!%p2161_p12), 1045509  }
 0x231   : > { %v1263_v26 = vcombine.high (!%p2161_p12), %v1245_v23, %v1245_v23  ;;  %v1405_v19 = vsub.s32 (!%p2161_p12), %v1387_v16, %v3397_v24  ;;  %vm1445_vm9 = vcmask (!%p2161_p12), 1046534   ;;  %vm1447_vm10 = vcmask (!%p2161_p12), 1047559  }
 0x232   : > { %v1270_v31 = vrot.slane (!%p2161_p12), %v1245_v23, %v1269_v28  ;;  %v1390_v14 = vld [vmem:[%s3739_s3] sm:$0xff] (!%p2161_p12)  ;;  %vm1452_vm11 = vcmask (!%p2161_p12), 64512   ;;  %vm1474_vm13 = vcmask (!%p2161_p12), 7168  }
 0x233   : > { %v1277_v34 = vrot.slane %v1263_v26, %v1269_v28 }
 0x234   : > { %v1286_v37 = vrot.slane %v1270_v31, %v1269_v28  ;;  %v1278_v40 = vcombine.high %v1270_v31, %v1270_v31 }
 0x235   : > { %v1293_v38 = vrot.slane %v1277_v34, %v1269_v28  ;;  %v1279_v39 = vcombine.high %v1277_v34, %v1277_v34 }
 0x236   : > { %v1315_v43 = vrot.slane %v1286_v37, %v3407_v32  ;;  %v1308_v44 = vcombine.high %v1286_v37, %v1286_v37  ;;  %v1300_v48 = vrot.slane %v1278_v40, %v1269_v28 }
 0x237   : > { %v1331_v45 = vrot.slane %v1293_v38, %v3407_v32  ;;  %v1307_v46 = vrot.slane %v1279_v39, %v1269_v28  ;;  %v1309_v49 = vcombine.high %v1293_v38, %v1293_v38 }
 0x238   : > { %v1352_v50 = vmul.f32 %v2188_v35, %v1315_v43  ;;  %v1323_v51 = vrot.slane %v1308_v44, %v3407_v32  ;;  %v1319_v55 = vrot.slane %v1300_v48, %v3407_v32  ;;  %v1310_v57 = vcombine.high %v1300_v48, %v1300_v48 }
 0x239   : > { %v1356_v52 = vmul.f32 %v2196_v36, %v1331_v45  ;;  %v1335_v53 = vrot.slane %v1307_v46, %v3407_v32  ;;  %v1311_v61 = vcombine.high %v1307_v46, %v1307_v46  ;;  %v1339_v3 = vrot.slane %v1309_v49, %v3407_v32 }
 0x23a   : > { %v1361_v58 = vsel %vm1360_vm3, %v1352_v50, 0.0  ;;  %v1354_v59 = vmul.f32 %v2192_v41, %v1323_v51  ;;  %v1327_v62 = vrot.slane %v1310_v57, %v3407_v32  ;;  %v1353_v2 = vmul.f32 %v2189_v47, %v1319_v55  ;;  %v1451_v57 = vld [vmem:[#allocation2] sm:$0xff] }
 0x23b   : > { %v1357_v60 = vmul.f32 %v2197_v42, %v1335_v53  ;;  %1362 = vadd.xlane.f32.xlu0 %v1361_v58  ;;  %v1373_v1 = vsel %vm1360_vm3, %v1356_v52, 0.0  ;;  %v1343_v7 = vrot.slane %v1311_v61, %v3407_v32  ;;  %v1358_v9 = vmul.f32 %v2200_v63, %v1339_v3 }
 0x23c   : > { %v1367_v0 = vsel %vm1360_vm3, %v1354_v59, 0.0  ;;  %v1355_v5 = vmul.f32 %v2193_v56, %v1327_v62  ;;  %v1364_v8 = vsel %vm1360_vm3, %v1353_v2, 0.0  ;;  %v1388_v45 = vstv %s2162_s24 }
 0x23d   : > { %1368 = vadd.xlane.f32.xlu1 %v1367_v0  ;;  %v1376_v4 = vsel %vm1360_vm3, %v1357_v60, 0.0  ;;  %v1359_v11 = vmul.f32 %v2201_v6, %v1343_v7  ;;  %v1379_v12 = vsel %vm1360_vm3, %v1358_v9, 0.0  ;;  %v1389_v49 = vadd.s32 %v1388_v45, %v1387_v16 }
 0x23e   : > { %v1370_v10 = vsel %vm1360_vm3, %v1355_v5, 0.0  ;;  %v1485_v5 = vsub.s32 1, %v3397_v24  ;;  %v1527_v16 = vsub.s32 7, %v3397_v24 }
 0x23f   : > { %1374 = vadd.xlane.f32.xlu0 %v1373_v1  ;;  %v1382_v13 = vsel %vm1360_vm3, %v1359_v11, 0.0  ;;  %v1520_v1 = vsub.s32 6, %v3397_v24 }
 0x241   : > { %1377 = vadd.xlane.f32.xlu1 %v1376_v4 }
 0x243   : > { %1365 = vadd.xlane.f32.xlu0 %v1364_v8  ;;  %v1492_v8 = vsub.s32 2, %v3397_v24 }
 0x245   : > { %1371 = vadd.xlane.f32.xlu1 %v1370_v10  ;;  %v1499_v10 = vsub.s32 3, %v3397_v24 }
 0x247   : > { %1380 = vadd.xlane.f32.xlu0 %v1379_v12  ;;  %v1506_v12 = vsub.s32 4, %v3397_v24 }
 0x249   : > { %1383 = vadd.xlane.f32.xlu1 %v1382_v13 }
 0x25d   : > { %1392 = vperm.xlu0 %2518, %v1390_v14  }
 0x2c8   : > { %v1363_v15 = vpop.xlane.xlu0 %1362 }
 0x2c9   : > { %v1406_v23 = vrot.slane %v1363_v15, %v1405_v19 }
 0x2ca   : > { %v1369_v17 = vpop.xlane.xlu1 %1368 }
 0x2cb   : > { %v1414_v26 = vrot.slane %v1369_v17, %v1405_v19 }
 0x2cc   : > { %v1375_v18 = vpop.xlane.xlu0 %1374 }
 0x2cd   : > { %v1422_v20 = vrot.slane %v1375_v18, %v1405_v19 }
 0x2ce   : > { %v1378_v21 = vpop.xlane.xlu1 %1377 }
 0x2cf   : > { %v1426_v38 = vrot.slane %v1378_v21, %v1405_v19 }
 0x2d0   : > { %v1366_v22 = vpop.xlane.xlu0 %1365 }
 0x2d1   : > { %v1410_v25 = vrot.slane %v1366_v22, %v1405_v19 }
 0x2d2   : > { %v1372_v28 = vpop.xlane.xlu1 %1371 }
 0x2d3   : > { %v1436_v30 = vsel %vm1435_vm4, %v1410_v25, %v1406_v23  ;;  %v1418_v31 = vrot.slane %v1372_v28, %v1405_v19 }
 0x2d4   : > { %v1438_v34 = vsel %vm1437_vm5, %v1414_v26, %v1436_v30  ;;  %v1381_v37 = vpop.xlane.xlu0 %1380 }
 0x2d5   : > { %v1440_v39 = vsel %vm1439_vm6, %v1418_v31, %v1438_v34  ;;  %v1430_v43 = vrot.slane %v1381_v37, %v1405_v19 }
 0x2d6   : > { %v1442_v40 = vsel %vm1441_vm7, %v1422_v20, %v1440_v39  ;;  %v1384_v44 = vpop.xlane.xlu1 %1383 }
 0x2d7   : > { %v1444_v46 = vsel %vm1443_vm8, %v1426_v38, %v1442_v40  ;;  %v1434_v48 = vrot.slane %v1384_v44, %v1405_v19 }
 0x2d8   : > { %v1446_v50 = vsel %vm1445_vm9, %v1430_v43, %v1444_v46 }
 0x2d9   : > { %v1448_v52 = vsel %vm1447_vm10, %v1434_v48, %v1446_v50 }
 0x2dc   : > { %v1393_v51 = vpop.permute.xlu0 %1392 }
 0x2dd   : > { %vm1394_vm12 = vcmp.lt.s32.totalorder %v1389_v49, %v1393_v51 }
 0x2de   : > { %v1450_v53 = vsel %vm1394_vm12, %v1448_v52, -1e+11 }
 0x2df   : > { %v1453_v55 = vsel %vm1452_vm11, %v1450_v53, -inf }
 0x2e0   : > { %1454 = vmax.xlane.f32.xlu1 %v1453_v55 }
 0x36d   : > { %v1455_v58 = vpop.xlane.xlu1 %1454 }
 0x36e   : > { %v1456_v59 = vmax.f32 %v1451_v57, %v1455_v58 }
 0x370   : > { %v1457_v60 = vsub.f32 %v1451_v57, %v1456_v59  ;;  %1621 = vst.msk [vmem:[#allocation2] sm:$0xff] %vm1474_vm13, %v1456_v59  ;;  %1462 = vperm.xlu1 %2519, %v1456_v59  }
 0x372   : > { %v1458_v13 = vmul.f32 1.442695, %v1457_v60 }
 0x3ef   : > { %v1463_v61 = vpop.permute.xlu1 %1462 }
 0x3f0   : > { %v1465_v62 = vsub.f32 %v1450_v53, %v1463_v61 }
 0x3f2   : > { %v1466_v0 = vmul.f32 1.442695, %v1465_v62 }
 0x3f4   : > { %2521 = vpow2.f32 %v1466_v0 }
 0x3f5   : > { %2523 = vpow2.f32 %v1458_v13 }
 0x3fe   : > { %v2522_v2 = vpop.eup %2521 }
 0x3ff   : > { %v1521_v3 = vrot.slane %v2522_v2, %v1520_v1  ;;  %v1479_v4 = vrot.slane %v2522_v2, %v3407_v32  ;;  %v1486_v7 = vrot.slane %v2522_v2, %v1485_v5  ;;  %v1493_v9 = vrot.slane %v2522_v2, %v1492_v8  ;;  %v3478_v18 = vpop.eup %2523 }
 0x400   : > { %v1500_v11 = vrot.slane %v2522_v2, %v1499_v10  ;;  %v1507_v14 = vrot.slane %v2522_v2, %v1506_v12  ;;  %v1513_v32 = vsub.s32 5, %v3397_v24  ;;  %v1528_v17 = vrot.slane %v2522_v2, %v1527_v16 }
 0x401   : > { %1523 = vbcast.lane.b32.xlu0 %v1521_v3, 256  ;;  %1481 = vbcast.lane.b32.xlu1 %v1479_v4, 256  ;;  %v1470_v19 = vsel %vm1452_vm11, %v2522_v2, 0.0 }
 0x402   : > { %v1514_v15 = vrot.slane %v2522_v2, %v1513_v32 }
 0x405   : > { %1488 = vbcast.lane.b32.xlu1 %v1486_v7, 256 }
 0x409   : > { %1495 = vbcast.lane.b32.xlu1 %v1493_v9, 256 }
 0x40d   : > { %1502 = vbcast.lane.b32.xlu1 %v1500_v11, 256 }
 0x411   : > { %1509 = vbcast.lane.b32.xlu1 %v1507_v14, 256 }
 0x415   : > { %1516 = vbcast.lane.b32.xlu1 %v1514_v15, 256 }
 0x419   : > { %1530 = vbcast.lane.b32.xlu1 %v1528_v17, 256 }
 0x41d   : > { %1599 = vperm.xlu1 %2519, %v3478_v18  }
 0x420   : > { %1471 = vadd.xlane.f32.xlu0 %v1470_v19 }
 0x473   : > { %v1482_v21 = vpop.permute.xlu1 %1481  ;;  %v1524_v30 = vpop.permute.xlu0 %1523 }
 0x474   : > { %v1532_v25 = vmul.f32 %v2188_v35, %v1482_v21 }
 0x476   : > { %v1540_v31 = vsel %vm1360_vm3, %v1532_v25, 0.0 }
 0x477   : > { %v1489_v22 = vpop.permute.xlu1 %1488  ;;  %v1541_v39 = vrot.slane %v1540_v31, 4 }
 0x478   : > { %v1533_v23 = vmul.f32 %v2189_v47, %v1489_v22  ;;  %v1538_v47 = vmul.f32 %v2200_v63, %v1524_v30 }
 0x479   : > { %v1542_v46 = vadd.f32 %v1541_v39, %v1540_v31 }
 0x47a   : > { %v1547_v24 = vsel %vm1360_vm3, %v1533_v23, 0.0  ;;  %v1582_v45 = vsel %vm1360_vm3, %v1538_v47, 0.0 }
 0x47b   : > { %v1496_v26 = vpop.permute.xlu1 %1495  ;;  %v1548_v20 = vrot.slane %v1547_v24, 4  ;;  %v1583_v51 = vrot.slane %v1582_v45, 4  ;;  %v1543_v53 = vrot.slane %v1542_v46, 2 }
 0x47c   : > { %v1534_v28 = vmul.f32 %v2192_v41, %v1496_v26 }
 0x47d   : > { %v1549_v35 = vadd.f32 %v1548_v20, %v1547_v24  ;;  %v1584_v61 = vadd.f32 %v1583_v51, %v1582_v45  ;;  %v1544_v2 = vadd.f32 %v1543_v53, %v1542_v46 }
 0x47e   : > { %v1554_v34 = vsel %vm1360_vm3, %v1534_v28, 0.0 }
 0x47f   : > { %v1555_v37 = vrot.slane %v1554_v34, 4  ;;  %v1503_v38 = vpop.permute.xlu1 %1502  ;;  %v1550_v50 = vrot.slane %v1549_v35, 2  ;;  %v1545_v12 = vrot.slane %v1544_v2, 1 }
 0x480   : > { %v1535_v27 = vmul.f32 %v2193_v56, %v1503_v38  ;;  %v1596_v38 = vld [vmem:[#allocation4] sm:$0xff] }
 0x481   : > { %v1556_v43 = vadd.f32 %v1555_v37, %v1554_v34  ;;  %v1551_v59 = vadd.f32 %v1550_v50, %v1549_v35 }
 0x482   : > { %v1561_v40 = vsel %vm1360_vm3, %v1535_v27, 0.0 }
 0x483   : > { %v1562_v41 = vrot.slane %v1561_v40, 4  ;;  %v1510_v44 = vpop.permute.xlu1 %1509  ;;  %v1557_v52 = vrot.slane %v1556_v43, 2  ;;  %v1552_v8 = vrot.slane %v1551_v59, 1 }
 0x484   : > { %v1536_v48 = vmul.f32 %v2196_v36, %v1510_v44  ;;  %v1468_v44 = vld [vmem:[#allocation3] sm:$0xff] }
 0x485   : > { %v1563_v49 = vadd.f32 %v1562_v41, %v1561_v40  ;;  %v1558_v62 = vadd.f32 %v1557_v52, %v1556_v43  ;;  %v1553_v16 = vadd.f32 %v1552_v8, %v1551_v59  ;;  %v1469_v45 = vmul.f32 %v3478_v18, %v1468_v44 }
 0x486   : > { %v1568_v63 = vsel %vm1360_vm3, %v1536_v48, 0.0 }
 0x487   : > { %v1569_v33 = vrot.slane %v1568_v63, 4  ;;  %v1517_v56 = vpop.permute.xlu1 %1516  ;;  %v1564_v55 = vrot.slane %v1563_v49, 2  ;;  %v1559_v9 = vrot.slane %v1558_v62, 1 }
 0x488   : > { %v1537_v57 = vmul.f32 %v2197_v42, %v1517_v56  ;;  %v1585_v42 = vrot.slane %v1584_v61, 2 }
 0x489   : > { %v1570_v58 = vadd.f32 %v1569_v33, %v1568_v63  ;;  %v1565_v3 = vadd.f32 %v1564_v55, %v1563_v49  ;;  %v1560_v19 = vadd.f32 %v1559_v9, %v1558_v62 }
 0x48a   : > { %v1575_v60 = vsel %vm1360_vm3, %v1537_v57, 0.0  ;;  %v1586_v17 = vadd.f32 %v1585_v42, %v1584_v61 }
 0x48b   : > { %v1571_v36 = vrot.slane %v1570_v58, 2  ;;  %v1576_v0 = vrot.slane %v1575_v60, 4  ;;  %v1531_v1 = vpop.permute.xlu1 %1530  ;;  %v1566_v13 = vrot.slane %v1565_v3, 1 }
 0x48c   : > { %v1539_v4 = vmul.f32 %v2201_v6, %v1531_v1  ;;  %v1546_v6 = vadd.f32 %v1545_v12, %v1544_v2  ;;  %v1587_v28 = vrot.slane %v1586_v17, 1 }
 0x48d   : > { %v1572_v5 = vadd.f32 %v1571_v36, %v1570_v58  ;;  %v1577_v7 = vadd.f32 %v1576_v0, %v1575_v60  ;;  %v1567_v22 = vadd.f32 %v1566_v13, %v1565_v3 }
 0x48e   : > { %v1589_v29 = vsel %vm1360_vm3, %v1539_v4, 0.0  ;;  %v1611_v24 = vsel %vm1435_vm4, %v1553_v16, %v1546_v6  ;;  %v1588_v39 = vadd.f32 %v1587_v28, %v1586_v17 }
 0x48f   : > { %v1578_v10 = vrot.slane %v1577_v7, 2  ;;  %v1590_v11 = vrot.slane %v1589_v29, 4  ;;  %v1573_v14 = vrot.slane %v1572_v5, 1  ;;  %v1612_v30 = vsel %vm1437_vm5, %v1560_v19, %v1611_v24 }
 0x490   : > { %v1613_v20 = vsel %vm1439_vm6, %v1567_v22, %v1612_v30 }
 0x491   : > { %v1579_v32 = vadd.f32 %v1578_v10, %v1577_v7  ;;  %v1591_v15 = vadd.f32 %v1590_v11, %v1589_v29  ;;  %v1574_v23 = vadd.f32 %v1573_v14, %v1572_v5 }
 0x493   : > { %v1580_v21 = vrot.slane %v1579_v32, 1  ;;  %v1592_v54 = vrot.slane %v1591_v15, 2  ;;  %v1614_v34 = vsel %vm1441_vm7, %v1574_v23, %v1613_v20 }
 0x495   : > { %v1593_v25 = vadd.f32 %v1592_v54, %v1591_v15  ;;  %v1581_v26 = vadd.f32 %v1580_v21, %v1579_v32 }
 0x497   : > { %v1594_v31 = vrot.slane %v1593_v25, 1  ;;  %v1615_v47 = vsel %vm1443_vm8, %v1581_v26, %v1614_v34 }
 0x498   : > { %v1616_v35 = vsel %vm1445_vm9, %v1588_v39, %v1615_v47 }
 0x499   : > { %v1595_v37 = vadd.f32 %v1594_v31, %v1593_v25 }
 0x49b   : > { %v1617_v43 = vsel %vm1447_vm10, %v1595_v37, %v1616_v35 }
 0x49c   : > { %v1600_v27 = vpop.permute.xlu1 %1599 }
 0x49d   : > { %v1602_v40 = vmul.f32 %v1600_v27, %v1596_v38 }
 0x49f   : > { %v1619_v41 = vadd.f32 %v1617_v43, %v1602_v40 }
 0x4a1   : > { %1620 = vst.msk [vmem:[#allocation4] sm:$0xff] %vm1360_vm3, %v1619_v41 }
 0x4ad   : > { %v1472_v46 = vpop.xlane.xlu0 %1471 }
 0x4ae   : > { %v1473_v48 = vadd.f32 %v1472_v46, %v1469_v45 }
 0x4b0   : > { %1475 = vst.msk [vmem:[#allocation3] sm:$0xff] %vm1474_vm13, %v1473_v48 }
 0x4b1 PF: > { %p3740_p3 = scmp.ne.s32.totalorder %s3051_s30, 0 }
 0x4b2   : > { %v2921_v50 = vmov (!%p3740_p3), 0   ;;  %s3741_s14 = sld [smem:[#allocation40_spill]] (!%p3740_p3)  ;;  %s3742_s5 = sld [smem:[#allocation39_spill]] (!%p3740_p3)  ;;  %v2922_v51 = vmov (!%p3740_p3), 0.0   ;;  %v1634_v33 = vld [vmem:[#allocation6] sm:$0xff] (!%p3740_p3)  ;;  %vm2923_vm14 = vmmov (!%p3740_p3), 0  }
 0x4b3   : > { %1624 = sbr.rel (%p3740_p3) target bundleno = 1579 (0x62b), region = 112  ;;  %2525 = vset.pattern.permute.xlu0 (!%p3740_p3), %v2921_v50  ;;  %2302 = vmatprep.subr.bf16.mxu0 (!%p3740_p3), %v2922_v51  ;;  %v1640_v53 = vpack.c.bf16 (!%p3740_p3), %v1634_v33, %v1634_v33  ;;  %vm1657_vm15 = vcmask (!%p3740_p3), 261120   ;;  %v1625_v57 = vld [vmem:[#allocation4] sm:$0xff] (!%p3740_p3)  ;;  %s3743_s28 = sld [smem:[#allocation41_spill]] (!%p3740_p3) }
 0x4b4   : > { %2310 = vmatprep.subr.bf16.mxu1 (!%p3740_p3), %v2922_v51  ;;  %2306 = vmatprep.mubr.msk.bf16.mxu0 (!%p3740_p3), %vm2923_vm14, %v2922_v51 }
 0x4b5   : > { %2314 = vmatprep.mubr.msk.bf16.mxu1 (!%p3740_p3), %vm2923_vm14, %v2922_v51 }
 0x4b7   : > { %v1626_v49 = vld [vmem:[#allocation3] sm:$0xff] (!%p3740_p3) }
 0x4b8   : > { %1629 = vperm.xlu0 (!%p3740_p3), %2525, %v1626_v49   ;;  %v2526_v63 = vld [vmem:[%s3741_s14] sm:$0xff] (!%p3740_p3)   ;;  %v2528_v52 = vld [vmem:[%s3741_s14 + $0x8] sm:$0xff] (!%p3740_p3)  }
 0x4b9   : > { %v2527_v18 = vld [vmem:[%s3742_s5] sm:$0xff] (!%p3740_p3)   ;;  %2303 = vmatpush3.bf16.msra.mxu0 (!%p3740_p3), %v2526_v63  ;;  %v2529_v56 = vld [vmem:[%s3742_s5 + $0x8] sm:$0xff] (!%p3740_p3)  }
 0x4ba   : > { %2311 = vmatpush3.bf16.msra.mxu1 %v2527_v18  ;;  %2304 = vmatprep.subr.bf16.mxu0 %v2922_v51  ;;  %v2170_v2 = vld [vmem:[%s3743_s28] ss:$0 sm:$0xff] }
 0x4bb   : > { %2312 = vmatprep.subr.bf16.mxu1 %v2922_v51 }
 0x4bd   : > { %2305 = vmatpush3.bf16.msra.mxu0 %v2528_v52 }
 0x4be   : > { %2313 = vmatpush3.bf16.msra.mxu1 %v2529_v56 }
 0x4c0   : > { %2307 = vmatmul.mubr.msk.bf16.vlgmr.msra.gmra.mrb[0].mxu0 %vm1657_vm15, %v1640_v53 }
 0x537   : > { %v1630_v55 = vpop.permute.xlu0 %1629 }
 0x538   : > { %2530 = vrcp.f32 %v1630_v55 }
 0x542   : > { %v2531_v58 = vpop.eup %2530 }
 0x543   : > { %v1633_v59 = vmul.f32 %v2531_v58, %v1625_v57 }
 0x545   : > { %v1635_v60 = vpack.c.bf16 %v1633_v59, %v1633_v59 }
 0x547   : > { %2315 = vmatmul.mubr.msk.bf16.vlgmr.msra.gmra.mrb[0].mxu1 %vm1657_vm15, %v1635_v60 }
 0x593   : > { %v1695_v61 = vpop.f32.mrb[0].mxu0 }
 0x594   : > { %v2308_v62 = vpop.f32.mrb[1].mxu0 }
 0x595   : > { %v1698_v36 = vpop.f32.mrb[2].mxu0 }
 0x596   : > { %v2309_v0 = vpop.f32.mrb[3].mxu0 }
 0x61a   : > { %v1750_v1 = vpop.f32.mrb[0].mxu1 }
 0x61b   : > { %v1751_v3 = vadd.f32 %v1750_v1, %v1695_v61  ;;  %v2316_v4 = vpop.f32.mrb[1].mxu1 }
 0x61c   : > { %v1753_v5 = vpop.f32.mrb[2].mxu1 }
 0x61d   : > { %v1763_v7 = vadd.f32 %v2170_v2, %v1751_v3  ;;  %v2317_v8 = vpop.f32.mrb[3].mxu1 }
 0x61f   : > { %2532 = vtanh.f32 %v1763_v7 }
 0x629   : > { %v2533_v29 = vpop.eup %2532 }
 0x62a   : > { %1765 = vst.msk [vmem:[#allocation5] sm:$0xff] %vm1657_vm15, %v2533_v29 }
 0x62b PF: > { %p2171_p4 = scmp.lt.s32.totalorder %s3051_s30, 1 }
 0x62c   : > { %s3744_s8 = sld [smem:[#allocation42_spill]] (!%p2171_p4)  ;;  %v2924_v9 = vmov (!%p2171_p4), 0.0   ;;  %vm2925_vm0 = vmmov (!%p2171_p4), 0   ;;  %vm1795_vm1 = vcmask (!%p2171_p4), 261120   ;;  %s3745_s17 = sld [smem:[#allocation43_spill]] (!%p2171_p4)  ;;  %v2926_v19 = vmov (!%p2171_p4), 0  }
 0x62d   : > { %1769 = sbr.rel (%p2171_p4) target bundleno = 2240 (0x8c0), region = 116  ;;  %2318 = vmatprep.subr.bf16.mxu0 (!%p2171_p4), %v2924_v9  ;;  %2322 = vmatprep.mubr.msk.bf16.mxu0 (!%p2171_p4), %vm2925_vm0, %v2924_v9  ;;  %v1840_v21 = vld [vmem:[#allocation7] sm:$0xff] (!%p2171_p4)  ;;  %vm1860_vm2 = vcmask (!%p2171_p4), 7168   ;;  %v1847_v31 = vld [vmem:[#allocation8] sm:$0xff] (!%p2171_p4) }
 0x62e   : > { %2534 = vset.pattern.permute.xlu0 (!%p2171_p4), %v2926_v19 }
 0x631   : > { %v1770_v11 = vld [vmem:[#allocation5] sm:$0xff] (!%p2171_p4) }
 0x632   : > { %v2535_v42 = vld [vmem:[%s3744_s8] sm:$0xff] (!%p2171_p4)   ;;  %v2536_v10 = vld [vmem:[%s3744_s8 + $0x8] sm:$0xff] (!%p2171_p4)   ;;  %v1771_v12 = vpack.c.bf16 (!%p2171_p4), %v1770_v11, %v1770_v11 }
 0x633   : > { %2319 = vmatpush3.bf16.msra.mxu0 (!%p2171_p4), %v2535_v42  ;;  %v2172_v13 = vld [vmem:[%s3745_s17] ss:$0 sm:$0xff] (!%p2171_p4) }
 0x634   : > { %2320 = vmatprep.subr.bf16.mxu0 %v2924_v9 }
 0x637   : > { %2321 = vmatpush3.bf16.msra.mxu0 %v2536_v10 }
 0x63a   : > { %2323 = vmatmul.mubr.msk.bf16.vlgmr.msra.gmra.mrb[0].mxu0 %vm1795_vm1, %v1771_v12 }
 0x70d   : > { %v1833_v14 = vpop.f32.mrb[0].mxu0 }
 0x70e   : > { %v1834_v32 = vadd.f32 %v2172_v13, %v1833_v14  ;;  %v2324_v15 = vpop.f32.mrb[1].mxu0 }
 0x70f   : > { %v1836_v16 = vpop.f32.mrb[2].mxu0 }
 0x710   : > { %1839 = vst [vmem:[%s3694_s29] sm:$0xff] %v1834_v32  ;;  %1841 = vmax.xlane.f32.xlu0 %v1834_v32  ;;  %v2325_v17 = vpop.f32.mrb[3].mxu0 }
 0x79d   : > { %v1842_v54 = vpop.xlane.xlu0 %1841 }
 0x79e   : > { %v1843_v6 = vmax.f32 %v1840_v21, %v1842_v54 }
 0x7a0   : > { %v1844_v22 = vsub.f32 %v1840_v21, %v1843_v6  ;;  %1862 = vst.msk [vmem:[#allocation7] sm:$0xff] %vm1860_vm2, %v1843_v6  ;;  %1851 = vperm.xlu0 %2534, %v1843_v6  }
 0x7a2   : > { %v1845_v28 = vmul.f32 1.442695, %v1844_v22 }
 0x81f   : > { %v1852_v23 = vpop.permute.xlu0 %1851 }
 0x820   : > { %v1854_v25 = vsub.f32 %v1834_v32, %v1852_v23 }
 0x822   : > { %v1855_v24 = vmul.f32 1.442695, %v1854_v25 }
 0x824   : > { %2537 = vpow2.f32 %v1855_v24 }
 0x825   : > { %2539 = vpow2.f32 %v1845_v28 }
 0x82e   : > { %v2538_v26 = vpop.eup %2537 }
 0x82f   : > { %1857 = vadd.xlane.f32.xlu1 %v2538_v26  ;;  %v2540_v30 = vpop.eup %2539 }
 0x830   : > { %v1848_v20 = vmul.f32 %v2540_v30, %v1847_v31 }
 0x8bc   : > { %v1858_v34 = vpop.xlane.xlu1 %1857 }
 0x8bd   : > { %v1859_v37 = vadd.f32 %v1858_v34, %v1848_v20 }
 0x8bf   : > { %1861 = vst.msk [vmem:[#allocation8] sm:$0xff] %vm1860_vm2, %v1859_v37 }
 0x8c0 PF: > { %p2176_p5 = scmp.ne.s32.totalorder %s3051_s30, 1 }
 0x8c1   : > { %v1867_v39 = vld [vmem:[#allocation7] sm:$0xff] (!%p2176_p5)  ;;  %vm1872_vm3 = vcmask (!%p2176_p5), 7168   ;;  %s3746_s11 = sld [smem:[#allocation45_spill]] (!%p2176_p5) }
 0x8c2   : > { %1866 = sbr.rel (%p2176_p5) target bundleno = 2263 (0x8d7), region = 120 }
 0x8c6   : > { %v1868_v38 = vld [vmem:[#allocation8] sm:$0xff] (!%p2176_p5) }
 0x8c7   : > { %2541 = vlog2.f32 (!%p2176_p5), %v1868_v38 }
 0x8d1   : > { %v2542_v47 = vpop.eup %2541 }
 0x8d2   : > { %v1870_v27 = vmul.f32 0.6931472, %v2542_v47 }
 0x8d4   : > { %v1871_v35 = vadd.f32 %v1870_v27, %v1867_v39 }
 0x8d6   : > { %1873 = vst.msk [vmem:[%s3746_s11] sm:$0xff] %vm1872_vm3, %v1871_v35 }
 0x8d7 PF: > { %s2927_s28 = smov [#allocation22]   ;;  %s2178_s13 = sadd.s32 4294967295, %s3051_s30 }
 0x8d8   : > { %s1905_s24 = sshll.u32 %s2927_s28, 4  ;;  %p3555_p11 = scmp.gt.s32.totalorder %s2178_s13, 0  ;;  %s1906_s24 = int_to_ptr.vmem [resolvable:$true] %s1905_s24 }
 0x8d9   : > { %s2741_s12 = scalar_lea.vmem %s1906_s24, 128  ;;  %p3748_p10 = scmp.eq.s32.totalorder %s3051_s30, 1 }
 0x8da   : > { %p2742_p2 = scmp.ne.s32.totalorder %s1906_s24, %s2741_s12  ;;  %p2748_p0 = scmp.lt.s32.totalorder %s1906_s24, %s1906_s24 }
 0x8db   : > { %p2749_p6 = scmp.lt.s32.totalorder %s2741_s12, %s2741_s12 }
 0x8dc   : > { %p2743_p1 = pnand %p2742_p2, %p3748_p10 }
 0x8dd   : > { %p2750_p13 = por %p2749_p6, %p2748_p0 }
 0x8de   : > { %p2744_p8 = pneg %p2743_p1 }
 0x8e0   : > { %p2751_p7 = pnand %p2750_p13, %p2744_p8 }
 0x8e2   : > { %2754 = shalt.err (!%p2751_p7)
}
 0x8e3   : > { %s3749_s17 = sld [smem:[#allocation46_spill]]  ;;  %p3750_p12 = pmov %p3748_p10 }
 0x8e9   : > { %s2755_s0 = scalar_lea.hbm %s3749_s17, 128 }
 0x8ea   : > { %p2756_p9 = scmp.ne.s32.totalorder %s3749_s17, %s2755_s0  ;;  %p2761_p5 = scmp.lt.u32.totalorder %s2755_s0, %s3749_s17 }
 0x8ec   : > { %p2757_p3 = pnand %p2756_p9, %p3750_p12 }
 0x8ee   : > { %p2758_p4 = pneg %p2757_p3 }
 0x8f0   : > { %p2763_p2 = pnand %p2761_p5, %p2758_p4 }
 0x8f2   : > { %2766 = shalt.err (!%p2763_p2)
}
 0x8f3   : > { %2354 = dma.vmem_to_hbm [thread:$0]  (%p3748_p10), %s1906_s24, 128, %s3749_s17, [#allocation23]  }
 0x8f4   : > { %s3773_s13 = smov (!%p3555_p11, %s2178_s13), 0  ;;  %s3751_s1 = scalar_lea.vmem [#allocation21], %s3343_s7 }
 0x8f5   : > { %s1891_s6 = sshll.u32 %s3751_s1, 4  ;;  %s2179_s19 = sshll.u32 %s3773_s13, 7  ;;  %s3581_s6 = int_to_ptr.vmem [resolvable:$true] %s1891_s6 }
 0x8f6   : > { %s3752_s11 = sld [smem:[#allocation44_spill]]  ;;  %s2928_s29 = smov [#allocation24]  }
 0x8f7   : > { %s3588_s12 = sshll.u32 %s2928_s29, 4  ;;  %s3753_s3 = sand.u32 1, %s2883_s22   ;;  %s1917_s12 = int_to_ptr.vmem [resolvable:$true] %s3588_s12 }
 0x8f8   : > { %s1875_s24 = scalar_lea.sflag [#allocation11], %s3753_s3  ;;  %s2767_s20 = scalar_lea.vmem %s3581_s6, 128 }
 0x8f9   : > { %p2768_p11 = scmp.ne.s32.totalorder %s3581_s6, %s2767_s20  ;;  %p3754_p1 = scmp.ne.s32.totalorder %s3724_s15, 0 }
 0x8fa   : > { %s2929_s7 = smov [#allocation21]  }
 0x8fb   : > { %p2769_p8 = pnand %p2768_p11, %p3754_p1  ;;  %s2771_s13 = sshll.u32 %s2929_s7, 4  ;;  %s2772_s13 = int_to_ptr.vmem [resolvable:$false] %s2771_s13 }
 0x8fc   : > { %s3586_s28 = scalar_lea.hbm %s3752_s11, %s2179_s19  ;;  %s2773_s1 = scalar_lea.vmem %s2772_s13, 256 }
 0x8fd   : > { %p2770_p0 = pneg %p2769_p8  ;;  %p2774_p6 = scmp.lt.s32.totalorder %s3581_s6, %s2772_s13 }
 0x8fe   : > { %p2775_p13 = scmp.lt.s32.totalorder %s2773_s1, %s2767_s20 }
 0x900   : > { %p2776_p7 = por %p2775_p13, %p2774_p6 }
 0x902   : > { %p2777_p9 = pnand %p2776_p7, %p2770_p0 }
 0x904   : > { %2780 = shalt.err (!%p2777_p9)
}
 0x905   : > { %s2781_s3 = scalar_lea.hbm %s3586_s28, 128  ;;  %s2785_s0 = scalar_lea.hbm %s3752_s11, 128 }
 0x906   : > { %p2782_p12 = scmp.ne.s32.totalorder %s3586_s28, %s2781_s3  ;;  %p2786_p5 = scmp.lt.u32.totalorder %s3586_s28, %s3752_s11 }
 0x907   : > { %p2787_p2 = scmp.lt.u32.totalorder %s2785_s0, %s2781_s3  ;;  %p2789_p11 = scmp.lt.u32.totalorder %s2781_s3, %s3586_s28 }
 0x908   : > { %p2783_p3 = pnand %p2782_p12, %p3754_p1 }
 0x909   : > { %p2788_p10 = por %p2787_p2, %p2786_p5 }
 0x90a   : > { %p2784_p4 = pneg %p2783_p3 }
 0x90b   : > { %p2790_p8 = por %p2789_p11, %p2788_p10 }
 0x90d   : > { %p2791_p0 = pnand %p2790_p8, %p2784_p4 }
 0x90f   : > { %2794 = shalt.err (!%p2791_p0)
}
 0x910   : > { %2352 = dma.vmem_to_hbm [thread:$0]  (%p3754_p1), %s3581_s6, 128, %s3586_s28, %s1875_s24  }
 0x911   : > { %s2795_s20 = scalar_lea.vmem %s1917_s12, 128  ;;  %p3755_p13 = scmp.eq.s32.totalorder %s3051_s30, 1 }
 0x912   : > { %p2796_p6 = scmp.ne.s32.totalorder %s1917_s12, %s2795_s20  ;;  %p2802_p12 = scmp.lt.s32.totalorder %s1917_s12, %s1917_s12 }
 0x913   : > { %p2803_p3 = scmp.lt.s32.totalorder %s2795_s20, %s2795_s20 }
 0x914   : > { %p2797_p7 = pnand %p2796_p6, %p3755_p13 }
 0x915   : > { %p2804_p5 = por %p2803_p3, %p2802_p12 }
 0x916   : > { %p2798_p9 = pneg %p2797_p7 }
 0x918   : > { %p2805_p2 = pnand %p2804_p5, %p2798_p9 }
 0x91a   : > { %2808 = shalt.err (!%p2805_p2)
}
 0x91b   : > { %s3756_s3 = sld [smem:[#allocation47_spill]]  ;;  %p3757_p4 = pmov %p3755_p13 }
 0x921   : > { %s2809_s15 = scalar_lea.hbm %s3756_s3, 128 }
 0x922   : > { %p2810_p1 = scmp.ne.s32.totalorder %s3756_s3, %s2809_s15  ;;  %p2815_p8 = scmp.lt.u32.totalorder %s2809_s15, %s3756_s3 }
 0x924   : > { %p2811_p10 = pnand %p2810_p1, %p3757_p4 }
 0x926   : > { %p2812_p11 = pneg %p2811_p10 }
 0x928   : > { %p2817_p0 = pnand %p2815_p8, %p2812_p11 }
 0x92a   : > { %2820 = shalt.err (!%p2817_p0)
}
 0x92b   : > { %p3758_p6 = pmov %p3757_p4  ;;  %p3759_p13 = pmov %p3757_p4 }
 0x92d   : > { %2356 = dma.vmem_to_hbm [thread:$0]  (%p3758_p6), %s1917_s12, 128, %s3756_s3, [#allocation23]  }
 0x92e   : > { %2870 = dma.done.wait (%p3759_p13), [#allocation23], 256   ;;  %p3760_p7 = pmov %p3757_p4 }
 0x930   : > { %2872 = vsyncadd (%p3760_p7), [#allocation23], 4294967040 }
 0x931 PF: > { %s1939_s29 = sand.u32 1, %s2879_s21   ;;  %p3761_p9 = scmp.ne.s32.totalorder %s3725_s10, 0 }
 0x932   : > { %p3762_p12 = scmp.ge.s32.totalorder %s2903_s27, 2  ;;  %s1940_s7 = scalar_lea.sflag [#allocation11], %s1939_s29 }
 0x934   : > { %p2386_p3 = pnand %p3762_p12, %p3761_p9 }
 0x936   : > { %2874 = dma.done.wait (!%p2386_p3), %s1940_s7, 128  }
 0x937   : > { %2876 = vsyncadd (!%p2386_p3), %s1940_s7, 4294967168  ;;  %p34_p5 = scmp.ge.s32.totalorder %s3217_s9, 4   ;;  %s3763_s21 = smov %s2883_s22 }
 0x938   : > { %s3764_s22 = smov %s2887_s23  ;;  %s3765_s23 = smov %s3267_s16 }
 0x939   : > { %s3766_s24 = smov %s2895_s25  ;;  %s3767_s25 = smov %s2899_s26 }
 0x93a   : > { %s3768_s26 = smov %s3244_s18  ;;  %s3769_s27 = smov %s3217_s9 }
 0x93b   :  { %36 = sbr.rel (!%p34_p5) target bundleno = 28 (0x1c), region = 201 }
 0x942   :  { %1945 = vsyncpa [#allocation10], 1 }
 0x943   :  { %1947 = vsyncpa [#allocation10 + $0x1], 1 }
 0x944   :  { %1948 = vsyncpa [#allocation13], 1 }
 0x945   :  { %1949 = vsyncpa [#allocation16], 1 }
 0x946   :  { %1951 = vsyncpa [#allocation16 + $0x1], 1 }
 0x947   :  { %1952 = vsyncpa [#allocation19], 1 }
 0x948   :  { %1953 = vsyncpa [#allocation11], 1 }
 0x949   :  { %1955 = vsyncpa [#allocation11 + $0x1], 1 }
 0x94a   :  { %1956 = vsyncpa [#allocation23], 1 }

</bundles_post_ra>
